<compile_context>
chip_gen: v6e
topology: v6e:2x2x1
jax: 0.10.0
libtpu: 0.0.40
codegen_flags: <defaults>
</compile_context>

<pallas_src>
import jax
import jax.numpy as jnp
from jax.experimental import pallas as pl
from jax.experimental.pallas import tpu as pltpu

H_BERT = 768
H_FC1 = 256


# ---------------------------------------------------------------------------
# Pallas kernel: pooler (dense + tanh) + fused fc1/fc[0] + MLP + sigmoid
# ---------------------------------------------------------------------------
def head_kernel(p_ref,                       # [2, TB, 768] bf16 pre-pooled {x1, x2}
                pw_ref, pb_ref,              # pooler: 768->768 (bf16 W, f32 b)
                wa_ref, wb_ref, ba_ref,      # fused fc1+fc[0]: two [768,256] bf16 + [1,256] f32
                wf2_ref, bf2_ref,            # fc[2]: 256->64
                wf3_ref, bf3_ref,            # fc[4]: 64->16
                wf4_ref, bf4_ref,            # fc[6]: 16->1, weight stored as [1,16] f32
                out_ref):
    tb = p_ref.shape[1]

    # --- BERT pooler: tanh(pooled @ Wp + bp); both sentences in one MXU pass ---
    ps = p_ref[...].reshape(2 * tb, H_BERT)                       # sublane merge, no copy
    hh = jnp.tanh(jnp.dot(ps, pw_ref[...],
                          preferred_element_type=jnp.float32) + pb_ref[...])
    h1 = hh[:tb].astype(jnp.bfloat16)
    h2 = hh[tb:].astype(jnp.bfloat16)

    # --- fc1 (applied to both pooled vectors) fused into fc[0] + ReLU ---
    l = jnp.dot(h1, wa_ref[...], preferred_element_type=jnp.float32)
    l = l + jnp.dot(h2, wb_ref[...], preferred_element_type=jnp.float32)
    l = jnp.maximum(l + ba_ref[...], 0.0)

    # --- fc[2], fc[4] with ReLU (bf16 matmul, f32 accumulate) ---
    l = jnp.maximum(jnp.dot(l.astype(jnp.bfloat16), wf2_ref[...],
                            preferred_element_type=jnp.float32) + bf2_ref[...], 0.0)
    l = jnp.maximum(jnp.dot(l.astype(jnp.bfloat16), wf3_ref[...],
                            preferred_element_type=jnp.float32) + bf3_ref[...], 0.0)

    # --- fc[6]: 16 -> 1 on the VPU/XLU (broadcast row, multiply, lane-reduce) ---
    logit = jnp.sum(l * wf4_ref[...], axis=-1, keepdims=True) + bf4_ref[...]
    out_ref[...] = jax.nn.sigmoid(logit)


def hidden_model_head(pooled_pair, kparams, *, tile_b=None):
    """pooled_pair: [2, B, 768] bf16 pre-pooled BERT vectors. Returns [B, 1] f32."""
    _, B, _ = pooled_pair.shape
    if tile_b is None:
        # Fill MXU rows (256 on v6e/v7x) for large B; round small B up to sublane=8.
        tile_b = 256 if B >= 256 else max(8, ((B + 7) // 8) * 8)
    Bp = pl.cdiv(B, tile_b) * tile_b
    if Bp != B:
        pooled_pair = jnp.pad(pooled_pair, ((0, 0), (0, Bp - B), (0, 0)))

    act_spec = pl.BlockSpec((2, tile_b, H_BERT), lambda i: (0, i, 0))
    # Constant index_map -> weights/biases stay VMEM-resident across batch tiles.
    w_specs = [pl.BlockSpec(p.shape, lambda i: (0, 0)) for p in kparams]
    out_spec = pl.BlockSpec((tile_b, 1), lambda i: (i, 0))

    out = pl.pallas_call(
        head_kernel,
        out_shape=jax.ShapeDtypeStruct((Bp, 1), jnp.float32),
        grid=(Bp // tile_b,),
        in_specs=[act_spec] + w_specs,
        out_specs=out_spec,
        compiler_params=pltpu.CompilerParams(
            dimension_semantics=("parallel",),        # v7x: shard batch over 2 TCs
            vmem_limit_bytes=32 * 1024 * 1024),
    )(pooled_pair, *kparams)
    return out[:B]


# ---------------------------------------------------------------------------
# Parameter construction (PyTorch nn.Linear-style init) and kernel-param prep
# ---------------------------------------------------------------------------
def make_linear(key, fan_in, fan_out):
    kw, kb = jax.random.split(key)
    bound = 1.0 / jnp.sqrt(jnp.float32(fan_in))
    w = jax.random.uniform(kw, (fan_in, fan_out), jnp.float32, -bound, bound)  # [in, out]
    b = jax.random.uniform(kb, (1, fan_out), jnp.float32, -bound, bound)
    return w, b


def make_params(key):
    ks = jax.random.split(key, 5)
    w1, b1 = make_linear(ks[0], 768, 256)     # fc1 (fc2 exists in the module but is unused)
    wf1, bf1 = make_linear(ks[1], 512, 256)   # fc[0]
    wf2, bf2 = make_linear(ks[2], 256, 64)    # fc[2]
    wf3, bf3 = make_linear(ks[3], 64, 16)     # fc[4]
    wf4, bf4 = make_linear(ks[4], 16, 1)      # fc[6]
    return (w1, b1, wf1, bf1, wf2, bf2, wf3, bf3, wf4, bf4)


def prepare_kernel_params(pooler_w, pooler_b, raw_head):
    """Fuse fc1 into fc[0] (exact algebra) and cast matmul weights to bf16."""
    w1, b1, wf1, bf1, wf2, bf2, wf3, bf3, wf4, bf4 = raw_head
    wa = w1 @ wf1[:H_FC1, :]                                       # [768, 256]
    wb = w1 @ wf1[H_FC1:, :]                                       # [768, 256]
    b_fused = b1 @ wf1[:H_FC1, :] + b1 @ wf1[H_FC1:, :] + bf1      # [1, 256]
    bf16 = jnp.bfloat16
    return (pooler_w.astype(bf16), pooler_b.astype(jnp.float32),
            wa.astype(bf16), wb.astype(bf16), b_fused.astype(jnp.float32),
            wf2.astype(bf16), bf2.astype(jnp.float32),
            wf3.astype(bf16), bf3.astype(jnp.float32),
            wf4.T.astype(jnp.float32), bf4.astype(jnp.float32))


# ---------------------------------------------------------------------------
# BERT surrogate (plain-JAX glue for the frozen, opaque external submodule)
# ---------------------------------------------------------------------------
# TODO(synk): the real BERT encoder (external constructor arg, run under no_grad)
# has no clean Pallas translation here; a deterministic embedding + masked-mean
# surrogate produces the pre-pooled vectors.  Its dense+tanh pooler IS fused into
# the Pallas kernel above.
def bert_pre_pool(ids, mask, emb_table):
    emb = emb_table[ids]                                           # [B, S, 768]
    m = mask.astype(jnp.float32)[..., None]                        # [B, S, 1]
    return (emb * m).sum(axis=1) / jnp.maximum(m.sum(axis=1), 1.0) # [B, 768]


def hidden_model_forward(x1_ids, x1_mask, x2_ids, x2_mask, emb_table, kparams):
    p1 = bert_pre_pool(x1_ids, x1_mask, emb_table)
    p2 = bert_pre_pool(x2_ids, x2_mask, emb_table)
    pooled_pair = jnp.stack([p1, p2], axis=0).astype(jnp.bfloat16)  # [2, B, 768]
    return hidden_model_head(pooled_pair, kparams)


# ---------------------------------------------------------------------------
# Pure-JAX f32 reference of the literal (un-fused) forward, for sanity check
# ---------------------------------------------------------------------------
def reference_forward(p1, p2, pooler_w, pooler_b, raw_head):
    h1 = jnp.tanh(p1 @ pooler_w + pooler_b)
    h2 = jnp.tanh(p2 @ pooler_w + pooler_b)
    w1, b1, wf1, bf1, wf2, bf2, wf3, bf3, wf4, bf4 = raw_head
    a1 = h1 @ w1 + b1
    a2 = h2 @ w1 + b1
    h = jnp.concatenate([a1, a2], axis=1)
    l = jnp.maximum(h @ wf1 + bf1, 0.0)
    l = jnp.maximum(l @ wf2 + bf2, 0.0)
    l = jnp.maximum(l @ wf3 + bf3, 0.0)
    return jax.nn.sigmoid(l @ wf4 + bf4)


if __name__ == "__main__":
    B, S, V = 8, 8, 64

    key = jax.random.PRNGKey(0)
    k_ids1, k_ids2, k_emb, k_pool, k_head = jax.random.split(key, 5)

    # Inputs (token ids + attention masks), deterministic.
    x1_ids = jax.random.randint(k_ids1, (B, S), 0, V, dtype=jnp.int32)
    x2_ids = jax.random.randint(k_ids2, (B, S), 0, V, dtype=jnp.int32)
    x1_mask = jnp.ones((B, S), dtype=jnp.int32)
    x2_mask = jnp.ones((B, S), dtype=jnp.int32).at[:, S // 2:].set(0)

    # Surrogate-BERT parameters.
    emb_table = jax.random.normal(k_emb, (V, H_BERT), jnp.float32) * 0.02
    pooler_w = jax.random.normal(k_pool, (H_BERT, H_BERT), jnp.float32) * 0.02
    pooler_b = jnp.zeros((1, H_BERT), jnp.float32)

    # Head (HiddenModel) parameters + fused/bf16 kernel params.
    raw_head = make_params(k_head)
    kparams = prepare_kernel_params(pooler_w, pooler_b, raw_head)

    pred = hidden_model_forward(x1_ids, x1_mask, x2_ids, x2_mask, emb_table, kparams)
    pred = jax.block_until_ready(pred)

    # Sanity check against the literal un-fused f32 forward (loose tol: bf16 path).
    p1 = bert_pre_pool(x1_ids, x1_mask, emb_table)
    p2 = bert_pre_pool(x2_ids, x2_mask, emb_table)
    ref = reference_forward(p1, p2, pooler_w, pooler_b, raw_head)

    assert pred.shape == (B, 1), pred.shape
    assert pred.dtype == jnp.float32
    assert bool(jnp.all((pred >= 0.0) & (pred <= 1.0)))
    assert float(jnp.max(jnp.abs(pred - ref))) < 2e-2
    print("KERNEL_OK")
</pallas_src>

<mosaic_0001>
module attributes {stable_mosaic.version = 11 : i64} {
  func.func @head_kernel(%arg0: i32, %arg1: memref<2x8x768xbf16, #tpu.memory_space<vmem>>, %arg2: memref<768x768xbf16, #tpu.memory_space<vmem>>, %arg3: memref<1x768xf32, #tpu.memory_space<vmem>>, %arg4: memref<768x256xbf16, #tpu.memory_space<vmem>>, %arg5: memref<768x256xbf16, #tpu.memory_space<vmem>>, %arg6: memref<1x256xf32, #tpu.memory_space<vmem>>, %arg7: memref<256x64xbf16, #tpu.memory_space<vmem>>, %arg8: memref<1x64xf32, #tpu.memory_space<vmem>>, %arg9: memref<64x16xbf16, #tpu.memory_space<vmem>>, %arg10: memref<1x16xf32, #tpu.memory_space<vmem>>, %arg11: memref<1x16xf32, #tpu.memory_space<vmem>>, %arg12: memref<1x1xf32, #tpu.memory_space<vmem>>, %arg13: memref<8x1xf32, #tpu.memory_space<vmem>>) attributes {dimension_semantics = [#tpu.dimension_semantics<parallel>], iteration_bounds = array<i64: 1>, scalar_prefetch = 0 : i64, scratch_operands = 0 : i64, tpu.core_type = #tpu.core_type<tc>, window_params = [{transform_indices = @transform_0, window_bounds = array<i64: 2, 8, 768>}, {pipeline_mode = #tpu.pipeline_mode<synchronous>, transform_indices = @transform_1, window_bounds = array<i64: 768, 768>}, {pipeline_mode = #tpu.pipeline_mode<synchronous>, transform_indices = @transform_2, window_bounds = array<i64: 1, 768>}, {pipeline_mode = #tpu.pipeline_mode<synchronous>, transform_indices = @transform_3, window_bounds = array<i64: 768, 256>}, {pipeline_mode = #tpu.pipeline_mode<synchronous>, transform_indices = @transform_4, window_bounds = array<i64: 768, 256>}, {pipeline_mode = #tpu.pipeline_mode<synchronous>, transform_indices = @transform_5, window_bounds = array<i64: 1, 256>}, {pipeline_mode = #tpu.pipeline_mode<synchronous>, transform_indices = @transform_6, window_bounds = array<i64: 256, 64>}, {pipeline_mode = #tpu.pipeline_mode<synchronous>, transform_indices = @transform_7, window_bounds = array<i64: 1, 64>}, {pipeline_mode = #tpu.pipeline_mode<synchronous>, transform_indices = @transform_8, window_bounds = array<i64: 64, 16>}, {pipeline_mode = #tpu.pipeline_mode<synchronous>, transform_indices = @transform_9, window_bounds = array<i64: 1, 16>}, {pipeline_mode = #tpu.pipeline_mode<synchronous>, transform_indices = @transform_10, window_bounds = array<i64: 1, 16>}, {pipeline_mode = #tpu.pipeline_mode<synchronous>, transform_indices = @transform_11, window_bounds = array<i64: 1, 1>}, {transform_indices = @transform_12, window_bounds = array<i64: 8, 1>}]} {
    %c0 = arith.constant 0 : index
    %c0_0 = arith.constant 0 : index
    %c0_1 = arith.constant 0 : index
    %0 = vector.load %arg1[%c0, %c0_0, %c0_1] : memref<2x8x768xbf16, #tpu.memory_space<vmem>>, vector<2x8x768xbf16>
    %1 = vector.shape_cast %0 : vector<2x8x768xbf16> to vector<16x768xbf16>
    %c0_2 = arith.constant 0 : index
    %c0_3 = arith.constant 0 : index
    %2 = vector.load %arg2[%c0_2, %c0_3] : memref<768x768xbf16, #tpu.memory_space<vmem>>, vector<768x768xbf16>
    %cst = arith.constant dense<0.000000e+00> : vector<16x768xf32>
    %3 = tpu.matmul %1, %2, %cst {dimension_numbers = #tpu.dot_dimension_numbers<[1], [0], [0], [1], [0, 0, 1, 1], [], []>} : vector<16x768xbf16>, vector<768x768xbf16>, vector<16x768xf32> -> vector<16x768xf32>
    %c0_4 = arith.constant 0 : index
    %c0_5 = arith.constant 0 : index
    %4 = vector.load %arg3[%c0_4, %c0_5] : memref<1x768xf32, #tpu.memory_space<vmem>>, vector<1x768xf32>
    %5 = vector.broadcast %4 : vector<1x768xf32> to vector<16x768xf32>
    %6 = arith.addf %3, %5 : vector<16x768xf32>
    %7 = math.tanh %6 : vector<16x768xf32>
    %8 = vector.extract_strided_slice %7 {offsets = [0, 0], sizes = [8, 768], strides = [1, 1]} : vector<16x768xf32> to vector<8x768xf32>
    %9 = arith.truncf %8 : vector<8x768xf32> to vector<8x768xbf16>
    %10 = vector.extract_strided_slice %7 {offsets = [8, 0], sizes = [8, 768], strides = [1, 1]} : vector<16x768xf32> to vector<8x768xf32>
    %11 = arith.truncf %10 : vector<8x768xf32> to vector<8x768xbf16>
    %c0_6 = arith.constant 0 : index
    %c0_7 = arith.constant 0 : index
    %12 = vector.load %arg4[%c0_6, %c0_7] : memref<768x256xbf16, #tpu.memory_space<vmem>>, vector<768x256xbf16>
    %cst_8 = arith.constant dense<0.000000e+00> : vector<8x256xf32>
    %13 = tpu.matmul %9, %12, %cst_8 {dimension_numbers = #tpu.dot_dimension_numbers<[1], [0], [0], [1], [0, 0, 1, 1], [], []>} : vector<8x768xbf16>, vector<768x256xbf16>, vector<8x256xf32> -> vector<8x256xf32>
    %c0_9 = arith.constant 0 : index
    %c0_10 = arith.constant 0 : index
    %14 = vector.load %arg5[%c0_9, %c0_10] : memref<768x256xbf16, #tpu.memory_space<vmem>>, vector<768x256xbf16>
    %cst_11 = arith.constant dense<0.000000e+00> : vector<8x256xf32>
    %15 = tpu.matmul %11, %14, %cst_11 {dimension_numbers = #tpu.dot_dimension_numbers<[1], [0], [0], [1], [0, 0, 1, 1], [], []>} : vector<8x768xbf16>, vector<768x256xbf16>, vector<8x256xf32> -> vector<8x256xf32>
    %16 = arith.addf %13, %15 : vector<8x256xf32>
    %c0_12 = arith.constant 0 : index
    %c0_13 = arith.constant 0 : index
    %17 = vector.load %arg6[%c0_12, %c0_13] : memref<1x256xf32, #tpu.memory_space<vmem>>, vector<1x256xf32>
    %18 = vector.broadcast %17 : vector<1x256xf32> to vector<8x256xf32>
    %19 = arith.addf %16, %18 : vector<8x256xf32>
    %cst_14 = arith.constant 0.000000e+00 : f32
    %20 = vector.broadcast %cst_14 : f32 to vector<8x256xf32>
    %21 = arith.maximumf %19, %20 : vector<8x256xf32>
    %22 = arith.truncf %21 : vector<8x256xf32> to vector<8x256xbf16>
    %c0_15 = arith.constant 0 : index
    %c0_16 = arith.constant 0 : index
    %23 = vector.load %arg7[%c0_15, %c0_16] : memref<256x64xbf16, #tpu.memory_space<vmem>>, vector<256x64xbf16>
    %cst_17 = arith.constant dense<0.000000e+00> : vector<8x64xf32>
    %24 = tpu.matmul %22, %23, %cst_17 {dimension_numbers = #tpu.dot_dimension_numbers<[1], [0], [0], [1], [0, 0, 1, 1], [], []>} : vector<8x256xbf16>, vector<256x64xbf16>, vector<8x64xf32> -> vector<8x64xf32>
    %c0_18 = arith.constant 0 : index
    %c0_19 = arith.constant 0 : index
    %25 = vector.load %arg8[%c0_18, %c0_19] : memref<1x64xf32, #tpu.memory_space<vmem>>, vector<1x64xf32>
    %26 = vector.broadcast %25 : vector<1x64xf32> to vector<8x64xf32>
    %27 = arith.addf %24, %26 : vector<8x64xf32>
    %cst_20 = arith.constant 0.000000e+00 : f32
    %28 = vector.broadcast %cst_20 : f32 to vector<8x64xf32>
    %29 = arith.maximumf %27, %28 : vector<8x64xf32>
    %30 = arith.truncf %29 : vector<8x64xf32> to vector<8x64xbf16>
    %c0_21 = arith.constant 0 : index
    %c0_22 = arith.constant 0 : index
    %31 = vector.load %arg9[%c0_21, %c0_22] : memref<64x16xbf16, #tpu.memory_space<vmem>>, vector<64x16xbf16>
    %cst_23 = arith.constant dense<0.000000e+00> : vector<8x16xf32>
    %32 = tpu.matmul %30, %31, %cst_23 {dimension_numbers = #tpu.dot_dimension_numbers<[1], [0], [0], [1], [0, 0, 1, 1], [], []>} : vector<8x64xbf16>, vector<64x16xbf16>, vector<8x16xf32> -> vector<8x16xf32>
    %c0_24 = arith.constant 0 : index
    %c0_25 = arith.constant 0 : index
    %33 = vector.load %arg10[%c0_24, %c0_25] : memref<1x16xf32, #tpu.memory_space<vmem>>, vector<1x16xf32>
    %34 = vector.broadcast %33 : vector<1x16xf32> to vector<8x16xf32>
    %35 = arith.addf %32, %34 : vector<8x16xf32>
    %cst_26 = arith.constant 0.000000e+00 : f32
    %36 = vector.broadcast %cst_26 : f32 to vector<8x16xf32>
    %37 = arith.maximumf %35, %36 : vector<8x16xf32>
    %c0_27 = arith.constant 0 : index
    %c0_28 = arith.constant 0 : index
    %38 = vector.load %arg11[%c0_27, %c0_28] : memref<1x16xf32, #tpu.memory_space<vmem>>, vector<1x16xf32>
    %39 = vector.broadcast %38 : vector<1x16xf32> to vector<8x16xf32>
    %40 = arith.mulf %37, %39 : vector<8x16xf32>
    %cst_29 = arith.constant dense<0.000000e+00> : vector<8xf32>
    %41 = vector.multi_reduction <add>, %40, %cst_29 [1] : vector<8x16xf32> to vector<8xf32>
    %42 = vector.shape_cast %41 : vector<8xf32> to vector<8x1xf32>
    %c0_30 = arith.constant 0 : index
    %c0_31 = arith.constant 0 : index
    %43 = vector.load %arg12[%c0_30, %c0_31] : memref<1x1xf32, #tpu.memory_space<vmem>>, vector<1x1xf32>
    %44 = vector.broadcast %43 : vector<1x1xf32> to vector<8x1xf32>
    %45 = arith.addf %42, %44 : vector<8x1xf32>
    %46 = arith.negf %45 : vector<8x1xf32>
    %47 = math.exp %46 : vector<8x1xf32>
    %cst_32 = arith.constant 1.000000e+00 : f32
    %48 = vector.broadcast %cst_32 : f32 to vector<8x1xf32>
    %49 = arith.addf %48, %47 : vector<8x1xf32>
    %50 = arith.divf %48, %49 : vector<8x1xf32>
    %c0_33 = arith.constant 0 : index
    %c0_34 = arith.constant 0 : index
    %51 = vector.load %arg13[%c0_33, %c0_34] : memref<8x1xf32, #tpu.memory_space<vmem>>, vector<8x1xf32>
    tpu.vector_store %arg13[%c0_33, %c0_34], %50 {strides = array<i32>} : memref<8x1xf32, #tpu.memory_space<vmem>>, vector<8x1xf32>,
    return
  }
  func.func @transform_0(%arg0: i32) -> (i32, i32, i32) {
    %c0_i32 = arith.constant 0 : i32
    %c0_i32_0 = arith.constant 0 : i32
    %c0_i32_1 = arith.constant 0 : i32
    return %c0_i32, %arg0, %c0_i32_0 : i32, i32, i32
  }
  func.func @transform_1(%arg0: i32) -> (i32, i32) {
    %c0_i32 = arith.constant 0 : i32
    %c0_i32_0 = arith.constant 0 : i32
    %c0_i32_1 = arith.constant 0 : i32
    return %c0_i32, %c0_i32_0 : i32, i32
  }
  func.func @transform_2(%arg0: i32) -> (i32, i32) {
    %c0_i32 = arith.constant 0 : i32
    %c0_i32_0 = arith.constant 0 : i32
    %c0_i32_1 = arith.constant 0 : i32
    return %c0_i32, %c0_i32_0 : i32, i32
  }
  func.func @transform_3(%arg0: i32) -> (i32, i32) {
    %c0_i32 = arith.constant 0 : i32
    %c0_i32_0 = arith.constant 0 : i32
    %c0_i32_1 = arith.constant 0 : i32
    return %c0_i32, %c0_i32_0 : i32, i32
  }
  func.func @transform_4(%arg0: i32) -> (i32, i32) {
    %c0_i32 = arith.constant 0 : i32
    %c0_i32_0 = arith.constant 0 : i32
    %c0_i32_1 = arith.constant 0 : i32
    return %c0_i32, %c0_i32_0 : i32, i32
  }
  func.func @transform_5(%arg0: i32) -> (i32, i32) {
    %c0_i32 = arith.constant 0 : i32
    %c0_i32_0 = arith.constant 0 : i32
    %c0_i32_1 = arith.constant 0 : i32
    return %c0_i32, %c0_i32_0 : i32, i32
  }
  func.func @transform_6(%arg0: i32) -> (i32, i32) {
    %c0_i32 = arith.constant 0 : i32
    %c0_i32_0 = arith.constant 0 : i32
    %c0_i32_1 = arith.constant 0 : i32
    return %c0_i32, %c0_i32_0 : i32, i32
  }
  func.func @transform_7(%arg0: i32) -> (i32, i32) {
    %c0_i32 = arith.constant 0 : i32
    %c0_i32_0 = arith.constant 0 : i32
    %c0_i32_1 = arith.constant 0 : i32
    return %c0_i32, %c0_i32_0 : i32, i32
  }
  func.func @transform_8(%arg0: i32) -> (i32, i32) {
    %c0_i32 = arith.constant 0 : i32
    %c0_i32_0 = arith.constant 0 : i32
    %c0_i32_1 = arith.constant 0 : i32
    return %c0_i32, %c0_i32_0 : i32, i32
  }
  func.func @transform_9(%arg0: i32) -> (i32, i32) {
    %c0_i32 = arith.constant 0 : i32
    %c0_i32_0 = arith.constant 0 : i32
    %c0_i32_1 = arith.constant 0 : i32
    return %c0_i32, %c0_i32_0 : i32, i32
  }
  func.func @transform_10(%arg0: i32) -> (i32, i32) {
    %c0_i32 = arith.constant 0 : i32
    %c0_i32_0 = arith.constant 0 : i32
    %c0_i32_1 = arith.constant 0 : i32
    return %c0_i32, %c0_i32_0 : i32, i32
  }
  func.func @transform_11(%arg0: i32) -> (i32, i32) {
    %c0_i32 = arith.constant 0 : i32
    %c0_i32_0 = arith.constant 0 : i32
    %c0_i32_1 = arith.constant 0 : i32
    return %c0_i32, %c0_i32_0 : i32, i32
  }
  func.func @transform_12(%arg0: i32) -> (i32, i32) {
    %c0_i32 = arith.constant 0 : i32
    %c0_i32_0 = arith.constant 0 : i32
    return %arg0, %c0_i32 : i32, i32
  }
}

</mosaic_0001>

<bundles_post_ra>
// kernel: tpu_custom_call.1
= control target key start
LH: loop header
LB: loop body
LE: loop exit
PB: predicated region body
PF: predicated region fallthrough
CT: control target
= control target key end

     0   :  { %s5890_s0 = inlined_call_operand.hbm [shape: bf16[2,8,768], index: 0, kind: input, shape index: {}]   ;;  %s5891_s1 = inlined_call_operand.hbm [shape: bf16[768,768], index: 1, kind: input, shape index: {}]   ;;  %s5892_s2 = inlined_call_operand.hbm [shape: f32[1,768], index: 2, kind: input, shape index: {}]   ;;  %s5893_s3 = inlined_call_operand.hbm [shape: bf16[768,256], index: 3, kind: input, shape index: {}]   ;;  %s5894_s4 = inlined_call_operand.hbm [shape: bf16[768,256], index: 4, kind: input, shape index: {}]   ;;  %s5895_s5 = inlined_call_operand.hbm [shape: f32[1,256], index: 5, kind: input, shape index: {}]   ;;  %s5896_s6 = inlined_call_operand.vmem [shape: bf16[256,64], index: 6, kind: input, shape index: {}]   ;;  %s5897_s7 = inlined_call_operand.hbm [shape: f32[1,64], index: 7, kind: input, shape index: {}]   ;;  %s5898_s8 = inlined_call_operand.vmem [shape: bf16[64,16], index: 8, kind: input, shape index: {}]   ;;  %s5899_s9 = inlined_call_operand.hbm [shape: f32[1,16], index: 9, kind: input, shape index: {}]   ;;  %s5900_s10 = inlined_call_operand.hbm [shape: f32[1,16], index: 10, kind: input, shape index: {}]   ;;  %s5901_s11 = inlined_call_operand.<no memory space> [shape: f32[1,1], index: 11, kind: input, shape index: {}]   ;;  %s5902_s12 = inlined_call_operand.vmem [shape: f32[8,1], index: 12, kind: output, shape index: {}]  }
   0x1   :  { %v17_v0 = vstv %s5901_s11 }
   0x2   :  { %18 = vst [vmem:[#allocation2] sm:$0x1] %v17_v0 }
   0x3   :  { %19 = vsyncpa [#allocation4], 0 }
   0x4   :  { %20 = vsyncpa [#allocation6], 0 }
   0x5   :  { %21 = vsyncpa [#allocation9], 0 }
   0x6   :  { %22 = vsyncpa [#allocation12], 0 }
   0x7   :  { %23 = vsyncpa [#allocation15], 0  ;;  %s5617_s23 = smov [#allocation5]   ;;  %s5618_s25 = smov [#allocation8]  }
   0x8   :  { %s41_s24 = sshll.u32 %s5617_s23, 4  ;;  %s63_s26 = sshll.u32 %s5618_s25, 4  ;;  %s42_s24 = int_to_ptr.vmem [resolvable:$true] %s41_s24  ;;  %s64_s26 = int_to_ptr.vmem [resolvable:$true] %s63_s26 }
   0x9   :  { %s5435_s27 = scalar_lea.vmem %s42_s24, 36864  ;;  %p5440_p1 = scmp.lt.s32.totalorder %s42_s24, %s42_s24 }
   0xa   :  { %p5436_p0 = scmp.ne.s32.totalorder %s42_s24, %s5435_s27  ;;  %p5441_p2 = scmp.lt.s32.totalorder %s5435_s27, %s5435_s27 }
   0xc   :  { %p5442_p3 = por %p5441_p2, %p5440_p1 }
   0xe   :  { %p5443_p4 = pnand %p5442_p3, %p5436_p0 }
  0x10   :  { %5446 = shalt.err (!%p5443_p4)
}
  0x11   :  { %s5619_s11 = smov 384   ;;  %s5620_s28 = smov 24  }
  0x12   :  { %47 = dma.hbm_to_vmem [thread:$0]  %s5891_s1, 36864, %s42_s24, [#allocation6], %s5619_s11, %s5619_s11, %s5620_s28  }
  0x13   :  { %s5455_s13 = scalar_lea.vmem %s64_s26, 12288  ;;  %p5460_p6 = scmp.lt.s32.totalorder %s64_s26, %s64_s26 }
  0x14   :  { %p5456_p5 = scmp.ne.s32.totalorder %s64_s26, %s5455_s13  ;;  %p5461_p7 = scmp.lt.s32.totalorder %s5455_s13, %s5455_s13 }
  0x16   :  { %p5462_p8 = por %p5461_p7, %p5460_p6 }
  0x18   :  { %p5463_p9 = pnand %p5462_p8, %p5456_p5 }
  0x1a   :  { %5466 = shalt.err (!%p5463_p9)
}
  0x1b   :  { %s5621_s14 = smov 128   ;;  %s5622_s15 = smov 8  }
  0x1c   :  { %69 = dma.hbm_to_vmem [thread:$0]  %s5893_s3, 12288, %s64_s26, [#allocation9], %s5621_s14, %s5621_s14, %s5622_s15  }
  0x1d   :  { %s5623_s18 = smov [#allocation11]   ;;  %s5624_s20 = smov [#allocation14]  }
  0x1e   :  { %s88_s19 = sshll.u32 %s5623_s18, 4  ;;  %s112_s1 = sshll.u32 %s5624_s20, 4  ;;  %s89_s19 = int_to_ptr.vmem [resolvable:$true] %s88_s19  ;;  %s113_s1 = int_to_ptr.vmem [resolvable:$true] %s112_s1 }
  0x1f   :  { %s5475_s21 = scalar_lea.vmem %s89_s19, 32  ;;  %p5480_p11 = scmp.lt.s32.totalorder %s89_s19, %s89_s19 }
  0x20   :  { %p5476_p10 = scmp.ne.s32.totalorder %s89_s19, %s5475_s21  ;;  %p5481_p12 = scmp.lt.s32.totalorder %s5475_s21, %s5475_s21 }
  0x22   :  { %p5482_p13 = por %p5481_p12, %p5480_p11 }
  0x24   :  { %p5483_p0 = pnand %p5482_p13, %p5476_p10 }
  0x26   :  { %5486 = shalt.err (!%p5483_p0)
}
  0x27   :  { %91 = dma.hbm_to_vmem [thread:$0]  %s5895_s5, 32, %s89_s19, [#allocation12]  }
  0x28   :  { %s5495_s24 = scalar_lea.vmem %s113_s1, 16  ;;  %s5499_s3 = scalar_lea.vmem %s113_s1, 32 }
  0x29   :  { %p5496_p1 = scmp.ne.s32.totalorder %s113_s1, %s5495_s24  ;;  %p5500_p2 = scmp.lt.s32.totalorder %s113_s1, %s113_s1 }
  0x2a   :  { %p5501_p3 = scmp.lt.s32.totalorder %s5499_s3, %s5495_s24 }
  0x2c   :  { %p5502_p4 = por %p5501_p3, %p5500_p2 }
  0x2e   :  { %p5503_p5 = pnand %p5502_p4, %p5496_p1 }
  0x30   :  { %5506 = shalt.err (!%p5503_p5)
}
  0x31   :  { %115 = dma.hbm_to_vmem [thread:$0]  %s5899_s9, 16, %s113_s1, [#allocation15]  }
  0x32   :  { %s5625_s27 = smov [#allocation3]   ;;  %s5626_s30 = smov [#allocation7]  }
  0x33   :  { %s29_s29 = sshll.u32 %s5625_s27, 4  ;;  %s54_s13 = sshll.u32 %s5626_s30, 4  ;;  %s30_s29 = int_to_ptr.vmem [resolvable:$true] %s29_s29  ;;  %s55_s13 = int_to_ptr.vmem [resolvable:$true] %s54_s13 }
  0x34   :  { %s5515_s16 = scalar_lea.vmem %s30_s29, 768  ;;  %p5520_p7 = scmp.lt.s32.totalorder %s30_s29, %s30_s29 }
  0x35   :  { %p5516_p6 = scmp.ne.s32.totalorder %s30_s29, %s5515_s16  ;;  %p5521_p8 = scmp.lt.s32.totalorder %s5515_s16, %s5515_s16 }
  0x37   :  { %p5522_p9 = por %p5521_p8, %p5520_p7 }
  0x39   :  { %p5523_p10 = pnand %p5522_p9, %p5516_p6 }
  0x3b   :  { %5526 = shalt.err (!%p5523_p10)
}
  0x3c   :  { %35 = dma.hbm_to_vmem [thread:$0]  %s5890_s0, 768, %s30_s29, [#allocation4], %s5619_s11, %s5619_s11, %s5620_s28  }
  0x3d   :  { %s5535_s9 = scalar_lea.vmem %s55_s13, 96  ;;  %p5540_p12 = scmp.lt.s32.totalorder %s55_s13, %s55_s13 }
  0x3e   :  { %p5536_p11 = scmp.ne.s32.totalorder %s55_s13, %s5535_s9  ;;  %p5541_p13 = scmp.lt.s32.totalorder %s5535_s9, %s5535_s9 }
  0x40   :  { %p5542_p0 = por %p5541_p13, %p5540_p12 }
  0x42   :  { %p5543_p1 = pnand %p5542_p0, %p5536_p11 }
  0x44   :  { %5546 = shalt.err (!%p5543_p1)
}
  0x45   :  { %57 = dma.hbm_to_vmem [thread:$0]  %s5892_s2, 96, %s55_s13, [#allocation6]  }
  0x46   :  { %s5627_s20 = smov [#allocation10]   ;;  %s5628_s21 = smov [#allocation13]  }
  0x47   :  { %s75_s1 = sshll.u32 %s5627_s20, 4  ;;  %s100_s22 = sshll.u32 %s5628_s21, 4  ;;  %s76_s1 = int_to_ptr.vmem [resolvable:$true] %s75_s1  ;;  %s101_s22 = int_to_ptr.vmem [resolvable:$true] %s100_s22 }
  0x48   :  { %s5555_s23 = scalar_lea.vmem %s76_s1, 12288  ;;  %p5560_p3 = scmp.lt.s32.totalorder %s76_s1, %s76_s1 }
  0x49   :  { %p5556_p2 = scmp.ne.s32.totalorder %s76_s1, %s5555_s23  ;;  %p5561_p4 = scmp.lt.s32.totalorder %s5555_s23, %s5555_s23 }
  0x4b   :  { %p5562_p5 = por %p5561_p4, %p5560_p3 }
  0x4d   :  { %p5563_p6 = pnand %p5562_p5, %p5556_p2 }
  0x4f   :  { %5566 = shalt.err (!%p5563_p6)
}
  0x50   :  { %81 = dma.hbm_to_vmem [thread:$0]  %s5894_s4, 12288, %s76_s1, [#allocation9], %s5621_s14, %s5621_s14, %s5622_s15  }
  0x51   :  { %s5575_s2 = scalar_lea.vmem %s101_s22, 16  ;;  %s5579_s28 = scalar_lea.vmem %s101_s22, 32 }
  0x52   :  { %p5576_p7 = scmp.ne.s32.totalorder %s101_s22, %s5575_s2  ;;  %p5580_p8 = scmp.lt.s32.totalorder %s101_s22, %s101_s22 }
  0x53   :  { %p5581_p9 = scmp.lt.s32.totalorder %s5579_s28, %s5575_s2 }
  0x55   :  { %p5582_p10 = por %p5581_p9, %p5580_p8 }
  0x57   :  { %p5583_p11 = pnand %p5582_p10, %p5576_p7 }
  0x59   :  { %5586 = shalt.err (!%p5583_p11)
}
  0x5a   :  { %103 = dma.hbm_to_vmem [thread:$0]  %s5897_s7, 16, %s101_s22, [#allocation12]  }
  0x5b   :  { %s5629_s25 = smov [#allocation16]  }
  0x5c   :  { %s122_s26 = sshll.u32 %s5629_s25, 4  ;;  %s123_s26 = int_to_ptr.vmem [resolvable:$true] %s122_s26 }
  0x5d   :  { %s5595_s27 = scalar_lea.vmem %s123_s26, 16  ;;  %s5599_s29 = scalar_lea.vmem %s123_s26, 32 }
  0x5e   :  { %p5596_p12 = scmp.ne.s32.totalorder %s123_s26, %s5595_s27  ;;  %p5600_p13 = scmp.lt.s32.totalorder %s123_s26, %s123_s26 }
  0x5f   :  { %p5601_p0 = scmp.lt.s32.totalorder %s5599_s29, %s5595_s27 }
  0x61   :  { %p5602_p1 = por %p5601_p0, %p5600_p13 }
  0x63   :  { %p5603_p2 = pnand %p5602_p1, %p5596_p12 }
  0x65   :  { %5606 = shalt.err (!%p5603_p2)
}
  0x66   :  { %125 = dma.hbm_to_vmem [thread:$0]  %s5900_s10, 16, %s123_s26, [#allocation15]  }
  0x67   :  { %5607 = dma.done.wait [#allocation4], 768  }
  0x68   :  { %5608 = vsyncadd [#allocation4], 4294966528 }
  0x69   :  { %5609 = dma.done.wait [#allocation6], 36960  }
  0x6a   :  { %5610 = vsyncadd [#allocation6], 4294930336 }
  0x6b   :  { %5611 = dma.done.wait [#allocation9], 24576  }
  0x6c   :  { %5612 = vsyncadd [#allocation9], 4294942720 }
  0x6d   :  { %5613 = dma.done.wait [#allocation12], 48  }
  0x6e   :  { %5614 = vsyncadd [#allocation12], 4294967248 }
  0x6f   :  { %5615 = dma.done.wait [#allocation15], 32  }
  0x70   :  { %5616 = vsyncadd [#allocation15], 4294967264  ;;  %v4643_v1 = vld [vmem:[#allocation5 + $0x154] ss:$24 sps:$4 sm:$0xff]   ;;  %v4645_v2 = vld [vmem:[#allocation5 + $0x150] ss:$24 sps:$4 sm:$0xff]  }
  0x71   :  { %1952 = vmatprep.subr.bf16.mxu0 %v4643_v1  ;;  %v4646_v3 = vld [vmem:[#allocation5 + $0x454] ss:$24 sps:$4 sm:$0xff]   ;;  %v4648_v4 = vld [vmem:[#allocation5 + $0x450] ss:$24 sps:$4 sm:$0xff]   ;;  %v4649_v5 = vld [vmem:[#allocation5 + $0x124] ss:$24 sps:$4 sm:$0xff]  }
  0x72   :  { %1953 = vmatpush1.bf16.msra.mxu0 %v4645_v2  ;;  %v4651_v6 = vld [vmem:[#allocation5 + $0x120] ss:$24 sps:$4 sm:$0xff]   ;;  %1995 = vmatprep.subr.bf16.mxu1 %v4646_v3  ;;  %v4652_v7 = vld [vmem:[#allocation5 + $0x424] ss:$24 sps:$4 sm:$0xff]   ;;  %v4655_v9 = vld [vmem:[#allocation5 + $0xf4] ss:$24 sps:$4 sm:$0xff]  }
  0x73   :  { %1996 = vmatpush1.bf16.msra.mxu1 %v4648_v4  ;;  %1954 = vmatprep.subr.bf16.mxu0 %v4649_v5  ;;  %v4654_v8 = vld [vmem:[#allocation5 + $0x420] ss:$24 sps:$4 sm:$0xff]   ;;  %v4657_v10 = vld [vmem:[#allocation5 + $0xf0] ss:$24 sps:$4 sm:$0xff]   ;;  %v4658_v11 = vld [vmem:[#allocation5 + $0x3f4] ss:$24 sps:$4 sm:$0xff]  }
  0x74   :  { %1997 = vmatprep.subr.bf16.mxu1 %v4652_v7  ;;  %v4661_v12 = vld [vmem:[#allocation5 + $0xc4] ss:$24 sps:$4 sm:$0xff]   ;;  %v4660_v13 = vld [vmem:[#allocation5 + $0x3f0] ss:$24 sps:$4 sm:$0xff]   ;;  %v4663_v15 = vld [vmem:[#allocation5 + $0xc0] ss:$24 sps:$4 sm:$0xff]  }
  0x75   :  { %v4664_v14 = vld [vmem:[#allocation5 + $0x3c4] ss:$24 sps:$4 sm:$0xff]   ;;  %v4667_v16 = vld [vmem:[#allocation5 + $0x94] ss:$24 sps:$4 sm:$0xff]   ;;  %v4666_v17 = vld [vmem:[#allocation5 + $0x3c0] ss:$24 sps:$4 sm:$0xff]  }
  0x76   :  { %1955 = vmatpush1.bf16.msra.mxu0 %v4651_v6  ;;  %v4670_v18 = vld [vmem:[#allocation5 + $0x394] ss:$24 sps:$4 sm:$0xff]   ;;  %v4669_v19 = vld [vmem:[#allocation5 + $0x90] ss:$24 sps:$4 sm:$0xff]   ;;  %v4673_v20 = vld [vmem:[#allocation5 + $0x64] ss:$24 sps:$4 sm:$0xff]  }
  0x77   :  { %1956 = vmatprep.subr.bf16.mxu0 %v4655_v9  ;;  %1998 = vmatpush1.bf16.msra.mxu1 %v4654_v8  ;;  %v4672_v21 = vld [vmem:[#allocation5 + $0x390] ss:$24 sps:$4 sm:$0xff]   ;;  %v4676_v22 = vld [vmem:[#allocation5 + $0x364] ss:$24 sps:$4 sm:$0xff]   ;;  %v4675_v23 = vld [vmem:[#allocation5 + $0x60] ss:$24 sps:$4 sm:$0xff]  }
  0x78   :  { %1999 = vmatprep.subr.bf16.mxu1 %v4658_v11  ;;  %v4679_v24 = vld [vmem:[#allocation5 + $0x34] ss:$24 sps:$4 sm:$0xff]   ;;  %v4678_v25 = vld [vmem:[#allocation5 + $0x360] ss:$24 sps:$4 sm:$0xff]   ;;  %v4681_v27 = vld [vmem:[#allocation5 + $0x30] ss:$24 sps:$4 sm:$0xff]  }
  0x79   :  { %v4682_v26 = vld [vmem:[#allocation5 + $0x334] ss:$24 sps:$4 sm:$0xff]   ;;  %v4685_v28 = vld [vmem:[#allocation5 + $0x4] ss:$24 sps:$4 sm:$0xff]   ;;  %v4684_v29 = vld [vmem:[#allocation5 + $0x330] ss:$24 sps:$4 sm:$0xff]  }
  0x7a   :  { %1957 = vmatpush1.bf16.msra.mxu0 %v4657_v10  ;;  %v4688_v30 = vld [vmem:[#allocation5 + $0x304] ss:$24 sps:$4 sm:$0xff]   ;;  %v4687_v31 = vld [vmem:[#allocation5] ss:$24 sps:$4 sm:$0xff]   ;;  %v4691_v32 = vld [vmem:[#allocation5 + $0x2d4] ss:$24 sps:$4 sm:$0xff]  }
  0x7b   :  { %1958 = vmatprep.subr.bf16.mxu0 %v4661_v12  ;;  %2000 = vmatpush1.bf16.msra.mxu1 %v4660_v13  ;;  %v4690_v33 = vld [vmem:[#allocation5 + $0x300] ss:$24 sps:$4 sm:$0xff]   ;;  %v4694_v34 = vld [vmem:[#allocation5 + $0x5d4] ss:$24 sps:$4 sm:$0xff]   ;;  %v4693_v35 = vld [vmem:[#allocation5 + $0x2d0] ss:$24 sps:$4 sm:$0xff]  }
  0x7c   :  { %2001 = vmatprep.subr.bf16.mxu1 %v4664_v14  ;;  %v4697_v36 = vld [vmem:[#allocation5 + $0x2a4] ss:$24 sps:$4 sm:$0xff]   ;;  %v4696_v37 = vld [vmem:[#allocation5 + $0x5d0] ss:$24 sps:$4 sm:$0xff]   ;;  %v4699_v39 = vld [vmem:[#allocation5 + $0x2a0] ss:$24 sps:$4 sm:$0xff]  }
  0x7d   :  { %v4700_v38 = vld [vmem:[#allocation5 + $0x5a4] ss:$24 sps:$4 sm:$0xff]   ;;  %v4703_v40 = vld [vmem:[#allocation5 + $0x274] ss:$24 sps:$4 sm:$0xff]   ;;  %v4702_v41 = vld [vmem:[#allocation5 + $0x5a0] ss:$24 sps:$4 sm:$0xff]  }
  0x7e   :  { %1959 = vmatpush1.bf16.msra.mxu0 %v4663_v15  ;;  %v4706_v42 = vld [vmem:[#allocation5 + $0x574] ss:$24 sps:$4 sm:$0xff]   ;;  %v4705_v43 = vld [vmem:[#allocation5 + $0x270] ss:$24 sps:$4 sm:$0xff]   ;;  %v4709_v44 = vld [vmem:[#allocation5 + $0x244] ss:$24 sps:$4 sm:$0xff]  }
  0x7f   :  { %1960 = vmatprep.subr.bf16.mxu0 %v4667_v16  ;;  %2002 = vmatpush1.bf16.msra.mxu1 %v4666_v17  ;;  %v4708_v45 = vld [vmem:[#allocation5 + $0x570] ss:$24 sps:$4 sm:$0xff]   ;;  %v4712_v46 = vld [vmem:[#allocation5 + $0x544] ss:$24 sps:$4 sm:$0xff]   ;;  %v4711_v47 = vld [vmem:[#allocation5 + $0x240] ss:$24 sps:$4 sm:$0xff]  }
  0x80   :  { %2003 = vmatprep.subr.bf16.mxu1 %v4670_v18  ;;  %v4738_v48 = vld [vmem:[#allocation3 + $0x4] ss:$24 sps:$4 sm:$0xff]   ;;  %v4714_v50 = vld [vmem:[#allocation5 + $0x540] ss:$24 sps:$4 sm:$0xff]   ;;  %v4717_v53 = vld [vmem:[#allocation5 + $0x210] ss:$24 sps:$4 sm:$0xff]  }
  0x81   :  { %v4715_v49 = vld [vmem:[#allocation5 + $0x214] ss:$24 sps:$4 sm:$0xff]   ;;  %1984 = vmatprep.mubr.bf16.mxu0 %v4738_v48  ;;  %v4721_v54 = vld [vmem:[#allocation5 + $0x1e4] ss:$24 sps:$4 sm:$0xff]   ;;  %v4720_v55 = vld [vmem:[#allocation5 + $0x510] ss:$24 sps:$4 sm:$0xff]  }
  0x82   :  { %1961 = vmatpush1.bf16.msra.mxu0 %v4669_v19  ;;  %v4718_v51 = vld [vmem:[#allocation5 + $0x514] ss:$24 sps:$4 sm:$0xff]   ;;  %v4724_v56 = vld [vmem:[#allocation5 + $0x4e4] ss:$24 sps:$4 sm:$0xff]   ;;  %v4723_v57 = vld [vmem:[#allocation5 + $0x1e0] ss:$24 sps:$4 sm:$0xff]  }
  0x83   :  { %1962 = vmatprep.subr.bf16.mxu0 %v4673_v20  ;;  %2004 = vmatpush1.bf16.msra.mxu1 %v4672_v21  ;;  %v5739_v52 = vld [vmem:[#allocation3 + $0xc] ss:$24 sps:$4 sm:$0xff]   ;;  %v4726_v59 = vld [vmem:[#allocation5 + $0x4e0] ss:$24 sps:$4 sm:$0xff]   ;;  %v4729_v61 = vld [vmem:[#allocation5 + $0x1b0] ss:$24 sps:$4 sm:$0xff]  }
  0x84   :  { %2005 = vmatprep.subr.bf16.mxu1 %v4676_v22  ;;  %2027 = vmatprep.mubr.bf16.mxu1 %v5739_v52  ;;  %v4727_v58 = vld [vmem:[#allocation5 + $0x1b4] ss:$24 sps:$4 sm:$0xff]   ;;  %v4733_v62 = vld [vmem:[#allocation5 + $0x184] ss:$24 sps:$4 sm:$0xff]   ;;  %v4732_v63 = vld [vmem:[#allocation5 + $0x4b0] ss:$24 sps:$4 sm:$0xff]  }
  0x85   :  { %v4730_v60 = vld [vmem:[#allocation5 + $0x4b4] ss:$24 sps:$4 sm:$0xff]   ;;  %v4736_v0 = vld [vmem:[#allocation5 + $0x484] ss:$24 sps:$4 sm:$0xff]   ;;  %v4735_v1 = vld [vmem:[#allocation5 + $0x180] ss:$24 sps:$4 sm:$0xff]  }
  0x86   :  { %1963 = vmatpush1.bf16.msra.mxu0 %v4675_v23  ;;  %v4744_v2 = vld [vmem:[#allocation5 + $0x754] ss:$24 sps:$4 sm:$0xff]   ;;  %v4740_v3 = vld [vmem:[#allocation5 + $0x480] ss:$24 sps:$4 sm:$0xff]   ;;  %v5742_v4 = vld [vmem:[#allocation3] ss:$24 sps:$4 sm:$0xff]  }
  0x87   :  { %1964 = vmatprep.subr.bf16.mxu0 %v4679_v24  ;;  %2006 = vmatpush1.bf16.msra.mxu1 %v4678_v25  ;;  %v4750_v5 = vld [vmem:[#allocation5 + $0x15c] ss:$24 sps:$4 sm:$0xff]   ;;  %v4742_v6 = vld [vmem:[#allocation5 + $0x750] ss:$24 sps:$4 sm:$0xff]   ;;  %v4756_v10 = vld [vmem:[#allocation5 + $0x12c] ss:$24 sps:$4 sm:$0xff]  }
  0x88   :  { %2007 = vmatprep.subr.bf16.mxu1 %v4682_v26  ;;  %v5744_v7 = vld [vmem:[#allocation3 + $0x8] ss:$24 sps:$4 sm:$0xff]   ;;  %v4753_v8 = vld [vmem:[#allocation5 + $0x724] ss:$24 sps:$4 sm:$0xff]   ;;  %v4759_v12 = vld [vmem:[#allocation5 + $0x6f4] ss:$24 sps:$4 sm:$0xff]  }
  0x89   :  { %v4748_v9 = vld [vmem:[#allocation5 + $0x158] ss:$24 sps:$4 sm:$0xff]   ;;  %v4754_v13 = vld [vmem:[#allocation5 + $0x128] ss:$24 sps:$4 sm:$0xff]   ;;  %v4762_v14 = vld [vmem:[#allocation5 + $0xfc] ss:$24 sps:$4 sm:$0xff]  }
  0x8a   :  { %1965 = vmatpush1.bf16.msra.mxu0 %v4681_v27  ;;  %v4751_v11 = vld [vmem:[#allocation5 + $0x720] ss:$24 sps:$4 sm:$0xff]   ;;  %v4757_v15 = vld [vmem:[#allocation5 + $0x6f0] ss:$24 sps:$4 sm:$0xff]   ;;  %v4765_v16 = vld [vmem:[#allocation5 + $0x6c4] ss:$24 sps:$4 sm:$0xff]  }
  0x8b   :  { %1966 = vmatprep.subr.bf16.mxu0 %v4685_v28  ;;  %2008 = vmatpush1.bf16.msra.mxu1 %v4684_v29  ;;  %v4760_v17 = vld [vmem:[#allocation5 + $0xf8] ss:$24 sps:$4 sm:$0xff]   ;;  %v4768_v18 = vld [vmem:[#allocation5 + $0xcc] ss:$24 sps:$4 sm:$0xff]   ;;  %v4766_v21 = vld [vmem:[#allocation5 + $0xc8] ss:$24 sps:$4 sm:$0xff]  }
  0x8c   :  { %2009 = vmatprep.subr.bf16.mxu1 %v4688_v30  ;;  %v4763_v19 = vld [vmem:[#allocation5 + $0x6c0] ss:$24 sps:$4 sm:$0xff]   ;;  %v4771_v20 = vld [vmem:[#allocation5 + $0x694] ss:$24 sps:$4 sm:$0xff]   ;;  %v4769_v23 = vld [vmem:[#allocation5 + $0x690] ss:$24 sps:$4 sm:$0xff]  }
  0x8d   :  { %v4774_v22 = vld [vmem:[#allocation5 + $0x9c] ss:$24 sps:$4 sm:$0xff]   ;;  %v4772_v25 = vld [vmem:[#allocation5 + $0x98] ss:$24 sps:$4 sm:$0xff]   ;;  %v4780_v26 = vld [vmem:[#allocation5 + $0x6c] ss:$24 sps:$4 sm:$0xff]  }
  0x8e   :  { %1967 = vmatpush1.bf16.msra.mxu0 %v4687_v31  ;;  %v4777_v24 = vld [vmem:[#allocation5 + $0x664] ss:$24 sps:$4 sm:$0xff]   ;;  %v4775_v27 = vld [vmem:[#allocation5 + $0x660] ss:$24 sps:$4 sm:$0xff]   ;;  %v4783_v28 = vld [vmem:[#allocation5 + $0x634] ss:$24 sps:$4 sm:$0xff]  }
  0x8f   :  { %1968 = vmatprep.subr.bf16.mxu0 %v4691_v32  ;;  %2010 = vmatpush1.bf16.msra.mxu1 %v4690_v33  ;;  %v4778_v29 = vld [vmem:[#allocation5 + $0x68] ss:$24 sps:$4 sm:$0xff]   ;;  %v4786_v30 = vld [vmem:[#allocation5 + $0x3c] ss:$24 sps:$4 sm:$0xff]   ;;  %v4784_v32 = vld [vmem:[#allocation5 + $0x38] ss:$24 sps:$4 sm:$0xff]  }
  0x90   :  { %2011 = vmatprep.subr.bf16.mxu1 %v4694_v34  ;;  %v4781_v31 = vld [vmem:[#allocation5 + $0x630] ss:$24 sps:$4 sm:$0xff]   ;;  %v4789_v33 = vld [vmem:[#allocation5 + $0x604] ss:$24 sps:$4 sm:$0xff]   ;;  %vm5631_vm0 = vmmov 0   ;;  %vm3995_vm1 = vcmask 523264  }
  0x91   :  { %v5748_v34 = vld [vmem:[#allocation3 + $0x14] ss:$24 sps:$4 sm:$0xff]   ;;  %vm4048_vm2 = vcmask 130048   ;;  %vm4066_vm3 = vcmask 7168  }
  0x92   :  { %1969 = vmatpush2.bf16.msra.mxu0 %v4693_v35  ;;  %v4792_v35 = vld [vmem:[#allocation5 + $0xc] ss:$24 sps:$4 sm:$0xff]  }
  0x93   :  { %1970 = vmatprep.subr.bf16.mxu0 %v4697_v36  ;;  %2012 = vmatpush2.bf16.msra.mxu1 %v4696_v37  ;;  %v4787_v36 = vld [vmem:[#allocation5 + $0x600] ss:$24 sps:$4 sm:$0xff]   ;;  %v4795_v37 = vld [vmem:[#allocation5 + $0x8d4] ss:$24 sps:$4 sm:$0xff]  }
  0x94   :  { %2013 = vmatprep.subr.bf16.mxu1 %v4700_v38  ;;  %v4790_v38 = vld [vmem:[#allocation5 + $0x8] ss:$24 sps:$4 sm:$0xff]  }
  0x96   :  { %1971 = vmatpush2.bf16.msra.mxu0 %v4699_v39  ;;  %v4798_v39 = vld [vmem:[#allocation5 + $0x2dc] ss:$24 sps:$4 sm:$0xff]  }
  0x97   :  { %1972 = vmatprep.subr.bf16.mxu0 %v4703_v40  ;;  %2014 = vmatpush2.bf16.msra.mxu1 %v4702_v41  ;;  %v4793_v40 = vld [vmem:[#allocation5 + $0x8d0] ss:$24 sps:$4 sm:$0xff]   ;;  %v4801_v41 = vld [vmem:[#allocation5 + $0x8a4] ss:$24 sps:$4 sm:$0xff]  }
  0x98   :  { %2015 = vmatprep.subr.bf16.mxu1 %v4706_v42  ;;  %v4796_v42 = vld [vmem:[#allocation5 + $0x2d8] ss:$24 sps:$4 sm:$0xff]  }
  0x9a   :  { %1973 = vmatpush2.bf16.msra.mxu0 %v4705_v43  ;;  %v4804_v43 = vld [vmem:[#allocation5 + $0x2ac] ss:$24 sps:$4 sm:$0xff]  }
  0x9b   :  { %1974 = vmatprep.subr.bf16.mxu0 %v4709_v44  ;;  %2016 = vmatpush2.bf16.msra.mxu1 %v4708_v45  ;;  %v4799_v44 = vld [vmem:[#allocation5 + $0x8a0] ss:$24 sps:$4 sm:$0xff]   ;;  %v4807_v45 = vld [vmem:[#allocation5 + $0x874] ss:$24 sps:$4 sm:$0xff]  }
  0x9c   :  { %2017 = vmatprep.subr.bf16.mxu1 %v4712_v46  ;;  %v4802_v46 = vld [vmem:[#allocation5 + $0x2a8] ss:$24 sps:$4 sm:$0xff]  }
  0x9e   :  { %1975 = vmatpush2.bf16.msra.mxu0 %v4711_v47  ;;  %v4810_v47 = vld [vmem:[#allocation5 + $0x27c] ss:$24 sps:$4 sm:$0xff]  }
  0x9f   :  { %1976 = vmatprep.subr.bf16.mxu0 %v4715_v49  ;;  %2018 = vmatpush2.bf16.msra.mxu1 %v4714_v50  ;;  %v4813_v49 = vld [vmem:[#allocation5 + $0x844] ss:$24 sps:$4 sm:$0xff]   ;;  %v4808_v50 = vld [vmem:[#allocation5 + $0x278] ss:$24 sps:$4 sm:$0xff]  }
  0xa0   :  { %2019 = vmatprep.subr.bf16.mxu1 %v4718_v51  ;;  %v4816_v51 = vld [vmem:[#allocation5 + $0x24c] ss:$24 sps:$4 sm:$0xff]  }
  0xa2   :  { %1977 = vmatpush2.bf16.msra.mxu0 %v4717_v53  ;;  %v4811_v53 = vld [vmem:[#allocation5 + $0x840] ss:$24 sps:$4 sm:$0xff]  }
  0xa3   :  { %1978 = vmatprep.subr.bf16.mxu0 %v4721_v54  ;;  %2020 = vmatpush2.bf16.msra.mxu1 %v4720_v55  ;;  %v4819_v54 = vld [vmem:[#allocation5 + $0x814] ss:$24 sps:$4 sm:$0xff]   ;;  %v4814_v55 = vld [vmem:[#allocation5 + $0x248] ss:$24 sps:$4 sm:$0xff]  }
  0xa4   :  { %2021 = vmatprep.subr.bf16.mxu1 %v4724_v56  ;;  %v4822_v56 = vld [vmem:[#allocation5 + $0x21c] ss:$24 sps:$4 sm:$0xff]  }
  0xa6   :  { %1979 = vmatpush2.bf16.msra.mxu0 %v4723_v57  ;;  %v4817_v57 = vld [vmem:[#allocation5 + $0x810] ss:$24 sps:$4 sm:$0xff]  }
  0xa7   :  { %1980 = vmatprep.subr.bf16.mxu0 %v4727_v58  ;;  %2022 = vmatpush2.bf16.msra.mxu1 %v4726_v59  ;;  %v4825_v58 = vld [vmem:[#allocation5 + $0x7e4] ss:$24 sps:$4 sm:$0xff]   ;;  %v4820_v59 = vld [vmem:[#allocation5 + $0x218] ss:$24 sps:$4 sm:$0xff]  }
  0xa8   :  { %2023 = vmatprep.subr.bf16.mxu1 %v4730_v60  ;;  %v4828_v60 = vld [vmem:[#allocation5 + $0x1ec] ss:$24 sps:$4 sm:$0xff]  }
  0xaa   :  { %1981 = vmatpush2.bf16.msra.mxu0 %v4729_v61  ;;  %v4823_v61 = vld [vmem:[#allocation5 + $0x7e0] ss:$24 sps:$4 sm:$0xff]  }
  0xab   :  { %1982 = vmatprep.subr.bf16.mxu0 %v4733_v62  ;;  %2024 = vmatpush2.bf16.msra.mxu1 %v4732_v63  ;;  %v4831_v62 = vld [vmem:[#allocation5 + $0x7b4] ss:$24 sps:$4 sm:$0xff]   ;;  %v4826_v63 = vld [vmem:[#allocation5 + $0x1e8] ss:$24 sps:$4 sm:$0xff]  }
  0xac   :  { %2025 = vmatprep.subr.bf16.mxu1 %v4736_v0  ;;  %v4834_v0 = vld [vmem:[#allocation5 + $0x1bc] ss:$24 sps:$4 sm:$0xff]  }
  0xae   :  { %1983 = vmatpush2.bf16.msra.mxu0 %v4735_v1  ;;  %v4829_v1 = vld [vmem:[#allocation5 + $0x7b0] ss:$24 sps:$4 sm:$0xff]  }
  0xaf   :  { %2038 = vmatprep.subr.bf16.mxu0 %v4744_v2  ;;  %2026 = vmatpush2.bf16.msra.mxu1 %v4740_v3  ;;  %v4837_v2 = vld [vmem:[#allocation5 + $0x784] ss:$24 sps:$4 sm:$0xff]   ;;  %v4832_v3 = vld [vmem:[#allocation5 + $0x1b8] ss:$24 sps:$4 sm:$0xff]  }
  0xb0   :  { %2081 = vmatprep.subr.bf16.mxu1 %v4750_v5  ;;  %v4840_v5 = vld [vmem:[#allocation5 + $0x18c] ss:$24 sps:$4 sm:$0xff]  }
  0xb1   :  { %1985 = vmatmul.mubr.bf16.vlgmr.msra.gmra.mxu0 %v5742_v4 }
  0xb2   :  { %2039 = vmatpush1.bf16.msra.mxu0 %v4742_v6  ;;  %2028 = vmatmul.mubr.bf16.vlgmr.msra.gmra.mxu1 %v5744_v7  ;;  %v4835_v6 = vld [vmem:[#allocation5 + $0x780] ss:$24 sps:$4 sm:$0xff]  }
  0xb3   :  { %2040 = vmatprep.subr.bf16.mxu0 %v4753_v8  ;;  %2082 = vmatpush1.bf16.msra.mxu1 %v4748_v9  ;;  %v4846_v8 = vld [vmem:[#allocation5 + $0x45c] ss:$24 sps:$4 sm:$0xff]   ;;  %v4838_v9 = vld [vmem:[#allocation5 + $0x188] ss:$24 sps:$4 sm:$0xff]  }
  0xb4   :  { %2113 = vmatprep.mubr.bf16.mxu1 %v4738_v48  ;;  %2083 = vmatprep.subr.bf16.mxu1 %v4756_v10  ;;  %v4805_v48 = vld [vmem:[#allocation5 + $0x870] ss:$24 sps:$4 sm:$0xff]   ;;  %v5751_v10 = vld [vmem:[#allocation3 + $0x10] ss:$24 sps:$4 sm:$0xff]  }
  0xb5   :  { %2070 = vmatprep.mubr.bf16.mxu0 %v5748_v34 }
  0xb6   :  { %2041 = vmatpush1.bf16.msra.mxu0 %v4751_v11  ;;  %v4849_v11 = vld [vmem:[#allocation5 + $0x75c] ss:$24 sps:$4 sm:$0xff]  }
  0xb7   :  { %2042 = vmatprep.subr.bf16.mxu0 %v4759_v12  ;;  %2084 = vmatpush1.bf16.msra.mxu1 %v4754_v13  ;;  %v4844_v12 = vld [vmem:[#allocation5 + $0x458] ss:$24 sps:$4 sm:$0xff]   ;;  %v4852_v13 = vld [vmem:[#allocation5 + $0x42c] ss:$24 sps:$4 sm:$0xff]  }
  0xb8   :  { %2085 = vmatprep.subr.bf16.mxu1 %v4762_v14  ;;  %v4847_v14 = vld [vmem:[#allocation5 + $0x758] ss:$24 sps:$4 sm:$0xff]  }
  0xba   :  { %2043 = vmatpush1.bf16.msra.mxu0 %v4757_v15  ;;  %v4855_v15 = vld [vmem:[#allocation5 + $0x72c] ss:$24 sps:$4 sm:$0xff]  }
  0xbb   :  { %2044 = vmatprep.subr.bf16.mxu0 %v4765_v16  ;;  %2086 = vmatpush1.bf16.msra.mxu1 %v4760_v17  ;;  %v4850_v16 = vld [vmem:[#allocation5 + $0x428] ss:$24 sps:$4 sm:$0xff]   ;;  %v4858_v17 = vld [vmem:[#allocation5 + $0x3fc] ss:$24 sps:$4 sm:$0xff]  }
  0xbc   :  { %2087 = vmatprep.subr.bf16.mxu1 %v4768_v18  ;;  %v4853_v18 = vld [vmem:[#allocation5 + $0x728] ss:$24 sps:$4 sm:$0xff]  }
  0xbe   :  { %2045 = vmatpush1.bf16.msra.mxu0 %v4763_v19  ;;  %v4861_v19 = vld [vmem:[#allocation5 + $0x6fc] ss:$24 sps:$4 sm:$0xff]  }
  0xbf   :  { %2046 = vmatprep.subr.bf16.mxu0 %v4771_v20  ;;  %2088 = vmatpush1.bf16.msra.mxu1 %v4766_v21  ;;  %v4856_v20 = vld [vmem:[#allocation5 + $0x3f8] ss:$24 sps:$4 sm:$0xff]   ;;  %v4864_v21 = vld [vmem:[#allocation5 + $0x3cc] ss:$24 sps:$4 sm:$0xff]  }
  0xc0   :  { %2089 = vmatprep.subr.bf16.mxu1 %v4774_v22  ;;  %v4859_v22 = vld [vmem:[#allocation5 + $0x6f8] ss:$24 sps:$4 sm:$0xff]  }
  0xc2   :  { %2047 = vmatpush1.bf16.msra.mxu0 %v4769_v23  ;;  %v4867_v23 = vld [vmem:[#allocation5 + $0x6cc] ss:$24 sps:$4 sm:$0xff]  }
  0xc3   :  { %2048 = vmatprep.subr.bf16.mxu0 %v4777_v24  ;;  %2090 = vmatpush1.bf16.msra.mxu1 %v4772_v25  ;;  %v4865_v24 = vld [vmem:[#allocation5 + $0x6c8] ss:$24 sps:$4 sm:$0xff]   ;;  %v4873_v25 = vld [vmem:[#allocation5 + $0x69c] ss:$24 sps:$4 sm:$0xff]  }
  0xc4   :  { %2091 = vmatprep.subr.bf16.mxu1 %v4780_v26  ;;  %v4868_v26 = vld [vmem:[#allocation5 + $0x398] ss:$24 sps:$4 sm:$0xff]  }
  0xc6   :  { %2049 = vmatpush1.bf16.msra.mxu0 %v4775_v27  ;;  %v4876_v27 = vld [vmem:[#allocation5 + $0x36c] ss:$24 sps:$4 sm:$0xff]  }
  0xc7   :  { %2050 = vmatprep.subr.bf16.mxu0 %v4783_v28  ;;  %2092 = vmatpush1.bf16.msra.mxu1 %v4778_v29  ;;  %v4871_v28 = vld [vmem:[#allocation5 + $0x698] ss:$24 sps:$4 sm:$0xff]   ;;  %v4879_v29 = vld [vmem:[#allocation5 + $0x66c] ss:$24 sps:$4 sm:$0xff]  }
  0xc8   :  { %2093 = vmatprep.subr.bf16.mxu1 %v4786_v30  ;;  %v4874_v30 = vld [vmem:[#allocation5 + $0x368] ss:$24 sps:$4 sm:$0xff]  }
  0xca   :  { %2051 = vmatpush1.bf16.msra.mxu0 %v4781_v31  ;;  %v4882_v31 = vld [vmem:[#allocation5 + $0x33c] ss:$24 sps:$4 sm:$0xff]  }
  0xcb   :  { %2052 = vmatprep.subr.bf16.mxu0 %v4789_v33  ;;  %2094 = vmatpush1.bf16.msra.mxu1 %v4784_v32  ;;  %v4877_v32 = vld [vmem:[#allocation5 + $0x668] ss:$24 sps:$4 sm:$0xff]   ;;  %v4885_v33 = vld [vmem:[#allocation5 + $0x63c] ss:$24 sps:$4 sm:$0xff]  }
  0xcc   :  { %2095 = vmatprep.subr.bf16.mxu1 %v4792_v35  ;;  %v4888_v35 = vld [vmem:[#allocation5 + $0x30c] ss:$24 sps:$4 sm:$0xff]  }
  0xce   :  { %2053 = vmatpush1.bf16.msra.mxu0 %v4787_v36  ;;  %v4883_v36 = vld [vmem:[#allocation5 + $0x638] ss:$24 sps:$4 sm:$0xff]  }
  0xcf   :  { %2054 = vmatprep.subr.bf16.mxu0 %v4795_v37  ;;  %2096 = vmatpush1.bf16.msra.mxu1 %v4790_v38  ;;  %v4891_v37 = vld [vmem:[#allocation5 + $0x60c] ss:$24 sps:$4 sm:$0xff]   ;;  %v4886_v38 = vld [vmem:[#allocation5 + $0x308] ss:$24 sps:$4 sm:$0xff]  }
  0xd0   :  { %2097 = vmatprep.subr.bf16.mxu1 %v4798_v39  ;;  %v4894_v39 = vld [vmem:[#allocation5 + $0x5dc] ss:$24 sps:$4 sm:$0xff]  }
  0xd2   :  { %2055 = vmatpush2.bf16.msra.mxu0 %v4793_v40  ;;  %v4889_v40 = vld [vmem:[#allocation5 + $0x608] ss:$24 sps:$4 sm:$0xff]  }
  0xd3   :  { %2056 = vmatprep.subr.bf16.mxu0 %v4801_v41  ;;  %2098 = vmatpush2.bf16.msra.mxu1 %v4796_v42  ;;  %v4897_v41 = vld [vmem:[#allocation5 + $0x8dc] ss:$24 sps:$4 sm:$0xff]   ;;  %v4892_v42 = vld [vmem:[#allocation5 + $0x5d8] ss:$24 sps:$4 sm:$0xff]  }
  0xd4   :  { %2099 = vmatprep.subr.bf16.mxu1 %v4804_v43  ;;  %v4900_v43 = vld [vmem:[#allocation5 + $0x5ac] ss:$24 sps:$4 sm:$0xff]  }
  0xd6   :  { %2057 = vmatpush2.bf16.msra.mxu0 %v4799_v44  ;;  %v4895_v44 = vld [vmem:[#allocation5 + $0x8d8] ss:$24 sps:$4 sm:$0xff]  }
  0xd7   :  { %2058 = vmatprep.subr.bf16.mxu0 %v4807_v45  ;;  %2100 = vmatpush2.bf16.msra.mxu1 %v4802_v46  ;;  %v4903_v45 = vld [vmem:[#allocation5 + $0x8ac] ss:$24 sps:$4 sm:$0xff]   ;;  %v4898_v46 = vld [vmem:[#allocation5 + $0x5a8] ss:$24 sps:$4 sm:$0xff]  }
  0xd8   :  { %2101 = vmatprep.subr.bf16.mxu1 %v4810_v47  ;;  %v4906_v47 = vld [vmem:[#allocation5 + $0x57c] ss:$24 sps:$4 sm:$0xff]  }
  0xda   :  { %2059 = vmatpush2.bf16.msra.mxu0 %v4805_v48  ;;  %v4901_v48 = vld [vmem:[#allocation5 + $0x8a8] ss:$24 sps:$4 sm:$0xff]  }
  0xdb   :  { %2060 = vmatprep.subr.bf16.mxu0 %v4813_v49  ;;  %2102 = vmatpush2.bf16.msra.mxu1 %v4808_v50  ;;  %v4909_v49 = vld [vmem:[#allocation5 + $0x87c] ss:$24 sps:$4 sm:$0xff]   ;;  %v4904_v50 = vld [vmem:[#allocation5 + $0x578] ss:$24 sps:$4 sm:$0xff]  }
  0xdc   :  { %2103 = vmatprep.subr.bf16.mxu1 %v4816_v51  ;;  %v4912_v51 = vld [vmem:[#allocation5 + $0x54c] ss:$24 sps:$4 sm:$0xff]  }
  0xde   :  { %2061 = vmatpush2.bf16.msra.mxu0 %v4811_v53  ;;  %v4907_v53 = vld [vmem:[#allocation5 + $0x878] ss:$24 sps:$4 sm:$0xff]  }
  0xdf   :  { %2062 = vmatprep.subr.bf16.mxu0 %v4819_v54  ;;  %2104 = vmatpush2.bf16.msra.mxu1 %v4814_v55  ;;  %v4915_v54 = vld [vmem:[#allocation5 + $0x84c] ss:$24 sps:$4 sm:$0xff]   ;;  %v4910_v55 = vld [vmem:[#allocation5 + $0x548] ss:$24 sps:$4 sm:$0xff]  }
  0xe0   :  { %2105 = vmatprep.subr.bf16.mxu1 %v4822_v56  ;;  %v4918_v56 = vld [vmem:[#allocation5 + $0x51c] ss:$24 sps:$4 sm:$0xff]  }
  0xe2   :  { %2063 = vmatpush2.bf16.msra.mxu0 %v4817_v57  ;;  %v4913_v57 = vld [vmem:[#allocation5 + $0x848] ss:$24 sps:$4 sm:$0xff]  }
  0xe3   :  { %2064 = vmatprep.subr.bf16.mxu0 %v4825_v58  ;;  %2106 = vmatpush2.bf16.msra.mxu1 %v4820_v59  ;;  %v4921_v58 = vld [vmem:[#allocation5 + $0x81c] ss:$24 sps:$4 sm:$0xff]   ;;  %v4916_v59 = vld [vmem:[#allocation5 + $0x518] ss:$24 sps:$4 sm:$0xff]  }
  0xe4   :  { %2107 = vmatprep.subr.bf16.mxu1 %v4828_v60  ;;  %v4924_v60 = vld [vmem:[#allocation5 + $0x4ec] ss:$24 sps:$4 sm:$0xff]  }
  0xe6   :  { %2065 = vmatpush2.bf16.msra.mxu0 %v4823_v61  ;;  %v4919_v61 = vld [vmem:[#allocation5 + $0x818] ss:$24 sps:$4 sm:$0xff]  }
  0xe7   :  { %2066 = vmatprep.subr.bf16.mxu0 %v4831_v62  ;;  %2108 = vmatpush2.bf16.msra.mxu1 %v4826_v63  ;;  %v4927_v62 = vld [vmem:[#allocation5 + $0x7ec] ss:$24 sps:$4 sm:$0xff]   ;;  %v4922_v63 = vld [vmem:[#allocation5 + $0x4e8] ss:$24 sps:$4 sm:$0xff]  }
  0xe8   :  { %2109 = vmatprep.subr.bf16.mxu1 %v4834_v0  ;;  %v4930_v0 = vld [vmem:[#allocation5 + $0x4bc] ss:$24 sps:$4 sm:$0xff]  }
  0xea   :  { %2067 = vmatpush2.bf16.msra.mxu0 %v4829_v1  ;;  %v4925_v1 = vld [vmem:[#allocation5 + $0x7e8] ss:$24 sps:$4 sm:$0xff]  }
  0xeb   :  { %2068 = vmatprep.subr.bf16.mxu0 %v4837_v2  ;;  %2110 = vmatpush2.bf16.msra.mxu1 %v4832_v3  ;;  %v4933_v2 = vld [vmem:[#allocation5 + $0x7bc] ss:$24 sps:$4 sm:$0xff]   ;;  %v4928_v3 = vld [vmem:[#allocation5 + $0x4b8] ss:$24 sps:$4 sm:$0xff]  }
  0xec   :  { %2111 = vmatprep.subr.bf16.mxu1 %v4840_v5  ;;  %v4936_v5 = vld [vmem:[#allocation5 + $0x48c] ss:$24 sps:$4 sm:$0xff]  }
  0xee   :  { %2069 = vmatpush2.bf16.msra.mxu0 %v4835_v6  ;;  %v4931_v6 = vld [vmem:[#allocation5 + $0x7b8] ss:$24 sps:$4 sm:$0xff]  }
  0xef   :  { %2124 = vmatprep.subr.bf16.mxu0 %v4846_v8  ;;  %2112 = vmatpush2.bf16.msra.mxu1 %v4838_v9  ;;  %v4939_v8 = vld [vmem:[#allocation5 + $0x78c] ss:$24 sps:$4 sm:$0xff]   ;;  %v4934_v9 = vld [vmem:[#allocation5 + $0x488] ss:$24 sps:$4 sm:$0xff]  }
  0xf0   :  { %2167 = vmatprep.subr.bf16.mxu1 %v4849_v11  ;;  %v4942_v11 = vld [vmem:[#allocation5 + $0x164] ss:$24 sps:$4 sm:$0xff]  }
  0xf1   :  { %2071 = vmatmul.mubr.bf16.vlgmr.msra.gmra.mxu0 %v5751_v10 }
  0xf2   :  { %2125 = vmatpush1.bf16.msra.mxu0 %v4844_v12  ;;  %2156 = vmatprep.mubr.bf16.mxu0 %v5739_v52  ;;  %v4862_v52 = vld [vmem:[#allocation5 + $0x3c8] ss:$24 sps:$4 sm:$0xff]  }
  0xf3   :  { %2114 = vmatmul.mubr.bf16.vlgmr.msra.gmra.mxu1 %v5742_v4  ;;  %2126 = vmatprep.subr.bf16.mxu0 %v4852_v13  ;;  %v4870_v4 = vld [vmem:[#allocation5 + $0x39c] ss:$24 sps:$4 sm:$0xff]   ;;  %v4937_v12 = vld [vmem:[#allocation5 + $0x788] ss:$24 sps:$4 sm:$0xff]  }
  0xf4   :  { %2168 = vmatpush1.bf16.msra.mxu1 %v4847_v14  ;;  %2199 = vmatprep.mubr.bf16.mxu1 %v5748_v34  ;;  %v4880_v34 = vld [vmem:[#allocation5 + $0x338] ss:$24 sps:$4 sm:$0xff]   ;;  %v4945_v13 = vld [vmem:[#allocation5 + $0x464] ss:$24 sps:$4 sm:$0xff]  }
  0xf5   :  { %2169 = vmatprep.subr.bf16.mxu1 %v4855_v15  ;;  %v4940_v14 = vld [vmem:[#allocation5 + $0x160] ss:$24 sps:$4 sm:$0xff]   ;;  %v4948_v15 = vld [vmem:[#allocation5 + $0x134] ss:$24 sps:$4 sm:$0xff]  }
  0xf6   :  { %2127 = vmatpush1.bf16.msra.mxu0 %v4850_v16  ;;  %v4943_v16 = vld [vmem:[#allocation5 + $0x460] ss:$24 sps:$4 sm:$0xff]  }
  0xf7   :  { %2128 = vmatprep.subr.bf16.mxu0 %v4858_v17  ;;  %v4951_v17 = vld [vmem:[#allocation5 + $0x434] ss:$24 sps:$4 sm:$0xff]  }
  0xf8   :  { %2170 = vmatpush1.bf16.msra.mxu1 %v4853_v18  ;;  %v4946_v18 = vld [vmem:[#allocation5 + $0x130] ss:$24 sps:$4 sm:$0xff]  }
  0xf9   :  { %2171 = vmatprep.subr.bf16.mxu1 %v4861_v19  ;;  %v5420_v19 = vld [vmem:[#allocation3 + $0x4] ss:$24 sps:$4 sm:$0xff]  }
  0xfa   :  { %2129 = vmatpush1.bf16.msra.mxu0 %v4856_v20  ;;  %v4954_v20 = vld [vmem:[#allocation5 + $0x104] ss:$24 sps:$4 sm:$0xff]  }
  0xfb   :  { %2130 = vmatprep.subr.bf16.mxu0 %v4864_v21  ;;  %v4949_v21 = vld [vmem:[#allocation5 + $0x430] ss:$24 sps:$4 sm:$0xff]  }
  0xfc   :  { %2172 = vmatpush1.bf16.msra.mxu1 %v4859_v22  ;;  %v5421_v22 = vld [vmem:[#allocation3 + $0xc] ss:$24 sps:$4 sm:$0xff]  }
  0xfd   :  { %2173 = vmatprep.subr.bf16.mxu1 %v4867_v23  ;;  %v4957_v23 = vld [vmem:[#allocation5 + $0x404] ss:$24 sps:$4 sm:$0xff]  }
  0xfe   :  { %2131 = vmatpush1.bf16.msra.mxu0 %v4862_v52  ;;  %v4952_v52 = vld [vmem:[#allocation5 + $0x100] ss:$24 sps:$4 sm:$0xff]  }
  0xff   :  { %2132 = vmatprep.subr.bf16.mxu0 %v4870_v4  ;;  %v4955_v4 = vld [vmem:[#allocation5 + $0x400] ss:$24 sps:$4 sm:$0xff]  }
 0x100   :  { %2174 = vmatpush1.bf16.msra.mxu1 %v4865_v24  ;;  %v4963_v24 = vld [vmem:[#allocation5 + $0x3d4] ss:$24 sps:$4 sm:$0xff]  }
 0x101   :  { %2175 = vmatprep.subr.bf16.mxu1 %v4873_v25  ;;  %v4958_v25 = vld [vmem:[#allocation5 + $0xd0] ss:$24 sps:$4 sm:$0xff]  }
 0x102   :  { %2133 = vmatpush1.bf16.msra.mxu0 %v4868_v26  ;;  %v4961_v26 = vld [vmem:[#allocation5 + $0x3d0] ss:$24 sps:$4 sm:$0xff]  }
 0x103   :  { %2134 = vmatprep.subr.bf16.mxu0 %v4876_v27  ;;  %v4969_v27 = vld [vmem:[#allocation5 + $0x3a4] ss:$24 sps:$4 sm:$0xff]  }
 0x104   :  { %2176 = vmatpush1.bf16.msra.mxu1 %v4871_v28  ;;  %v4964_v28 = vld [vmem:[#allocation5 + $0xa0] ss:$24 sps:$4 sm:$0xff]  }
 0x105   :  { %2177 = vmatprep.subr.bf16.mxu1 %v4879_v29  ;;  %v4972_v29 = vld [vmem:[#allocation5 + $0x74] ss:$24 sps:$4 sm:$0xff]  }
 0x106   :  { %2135 = vmatpush1.bf16.msra.mxu0 %v4874_v30  ;;  %v4967_v30 = vld [vmem:[#allocation5 + $0x3a0] ss:$24 sps:$4 sm:$0xff]  }
 0x107   :  { %2136 = vmatprep.subr.bf16.mxu0 %v4882_v31  ;;  %v4975_v31 = vld [vmem:[#allocation5 + $0x374] ss:$24 sps:$4 sm:$0xff]  }
 0x108   :  { %2178 = vmatpush1.bf16.msra.mxu1 %v4877_v32  ;;  %v4970_v32 = vld [vmem:[#allocation5 + $0x70] ss:$24 sps:$4 sm:$0xff]  }
 0x109   :  { %2179 = vmatprep.subr.bf16.mxu1 %v4885_v33  ;;  %v4978_v33 = vld [vmem:[#allocation5 + $0x44] ss:$24 sps:$4 sm:$0xff]  }
 0x10a   :  { %2137 = vmatpush1.bf16.msra.mxu0 %v4880_v34  ;;  %v4973_v34 = vld [vmem:[#allocation5 + $0x370] ss:$24 sps:$4 sm:$0xff]  }
 0x10b   :  { %2138 = vmatprep.subr.bf16.mxu0 %v4888_v35  ;;  %v4981_v35 = vld [vmem:[#allocation5 + $0x344] ss:$24 sps:$4 sm:$0xff]  }
 0x10c   :  { %2180 = vmatpush1.bf16.msra.mxu1 %v4883_v36  ;;  %v4976_v36 = vld [vmem:[#allocation5 + $0x40] ss:$24 sps:$4 sm:$0xff]  }
 0x10d   :  { %2181 = vmatprep.subr.bf16.mxu1 %v4891_v37  ;;  %v4984_v37 = vld [vmem:[#allocation5 + $0x14] ss:$24 sps:$4 sm:$0xff]  }
 0x10e   :  { %2139 = vmatpush1.bf16.msra.mxu0 %v4886_v38  ;;  %v4979_v38 = vld [vmem:[#allocation5 + $0x340] ss:$24 sps:$4 sm:$0xff]  }
 0x10f   :  { %2140 = vmatprep.subr.bf16.mxu0 %v4894_v39  ;;  %v4987_v39 = vld [vmem:[#allocation5 + $0x314] ss:$24 sps:$4 sm:$0xff]  }
 0x110   :  { %2182 = vmatpush1.bf16.msra.mxu1 %v4889_v40  ;;  %v4982_v40 = vld [vmem:[#allocation5 + $0x10] ss:$24 sps:$4 sm:$0xff]  }
 0x111   :  { %2183 = vmatprep.subr.bf16.mxu1 %v4897_v41  ;;  %v4990_v41 = vld [vmem:[#allocation5 + $0x2e4] ss:$24 sps:$4 sm:$0xff]  }
 0x112   :  { %2141 = vmatpush2.bf16.msra.mxu0 %v4892_v42  ;;  %v4985_v42 = vld [vmem:[#allocation5 + $0x310] ss:$24 sps:$4 sm:$0xff]  }
 0x113   :  { %2142 = vmatprep.subr.bf16.mxu0 %v4900_v43  ;;  %v4993_v43 = vld [vmem:[#allocation5 + $0x5e4] ss:$24 sps:$4 sm:$0xff]  }
 0x114   :  { %2184 = vmatpush2.bf16.msra.mxu1 %v4895_v44  ;;  %v4988_v44 = vld [vmem:[#allocation5 + $0x2e0] ss:$24 sps:$4 sm:$0xff]  }
 0x115   :  { %2185 = vmatprep.subr.bf16.mxu1 %v4903_v45  ;;  %v4996_v45 = vld [vmem:[#allocation5 + $0x2b4] ss:$24 sps:$4 sm:$0xff]  }
 0x116   :  { %2143 = vmatpush2.bf16.msra.mxu0 %v4898_v46  ;;  %v4991_v46 = vld [vmem:[#allocation5 + $0x5e0] ss:$24 sps:$4 sm:$0xff]  }
 0x117   :  { %2144 = vmatprep.subr.bf16.mxu0 %v4906_v47  ;;  %v4999_v47 = vld [vmem:[#allocation5 + $0x5b4] ss:$24 sps:$4 sm:$0xff]  }
 0x118   :  { %2186 = vmatpush2.bf16.msra.mxu1 %v4901_v48  ;;  %v4994_v48 = vld [vmem:[#allocation5 + $0x2b0] ss:$24 sps:$4 sm:$0xff]  }
 0x119   :  { %2187 = vmatprep.subr.bf16.mxu1 %v4909_v49  ;;  %v5002_v49 = vld [vmem:[#allocation5 + $0x284] ss:$24 sps:$4 sm:$0xff]  }
 0x11a   :  { %2145 = vmatpush2.bf16.msra.mxu0 %v4904_v50  ;;  %v4997_v50 = vld [vmem:[#allocation5 + $0x5b0] ss:$24 sps:$4 sm:$0xff]  }
 0x11b   :  { %2146 = vmatprep.subr.bf16.mxu0 %v4912_v51  ;;  %v5000_v51 = vld [vmem:[#allocation5 + $0x280] ss:$24 sps:$4 sm:$0xff]  }
 0x11c   :  { %2188 = vmatpush2.bf16.msra.mxu1 %v4907_v53  ;;  %v5005_v53 = vld [vmem:[#allocation5 + $0x584] ss:$24 sps:$4 sm:$0xff]  }
 0x11d   :  { %2189 = vmatprep.subr.bf16.mxu1 %v4915_v54  ;;  %v5008_v54 = vld [vmem:[#allocation5 + $0x254] ss:$24 sps:$4 sm:$0xff]  }
 0x11e   :  { %2147 = vmatpush2.bf16.msra.mxu0 %v4910_v55  ;;  %v5003_v55 = vld [vmem:[#allocation5 + $0x580] ss:$24 sps:$4 sm:$0xff]  }
 0x11f   :  { %2148 = vmatprep.subr.bf16.mxu0 %v4918_v56  ;;  %v5011_v56 = vld [vmem:[#allocation5 + $0x554] ss:$24 sps:$4 sm:$0xff]  }
 0x120   :  { %2190 = vmatpush2.bf16.msra.mxu1 %v4913_v57  ;;  %v5006_v57 = vld [vmem:[#allocation5 + $0x250] ss:$24 sps:$4 sm:$0xff]  }
 0x121   :  { %2191 = vmatprep.subr.bf16.mxu1 %v4921_v58  ;;  %v5014_v58 = vld [vmem:[#allocation5 + $0x224] ss:$24 sps:$4 sm:$0xff]  }
 0x122   :  { %2149 = vmatpush2.bf16.msra.mxu0 %v4916_v59  ;;  %v5009_v59 = vld [vmem:[#allocation5 + $0x550] ss:$24 sps:$4 sm:$0xff]  }
 0x123   :  { %2150 = vmatprep.subr.bf16.mxu0 %v4924_v60  ;;  %v5017_v60 = vld [vmem:[#allocation5 + $0x524] ss:$24 sps:$4 sm:$0xff]  }
 0x124   :  { %2192 = vmatpush2.bf16.msra.mxu1 %v4919_v61  ;;  %v5012_v61 = vld [vmem:[#allocation5 + $0x220] ss:$24 sps:$4 sm:$0xff]  }
 0x125   :  { %2193 = vmatprep.subr.bf16.mxu1 %v4927_v62  ;;  %v5020_v62 = vld [vmem:[#allocation5 + $0x1f4] ss:$24 sps:$4 sm:$0xff]  }
 0x126   :  { %2151 = vmatpush2.bf16.msra.mxu0 %v4922_v63  ;;  %v5015_v63 = vld [vmem:[#allocation5 + $0x520] ss:$24 sps:$4 sm:$0xff]  }
 0x127   :  { %2152 = vmatprep.subr.bf16.mxu0 %v4930_v0  ;;  %v5023_v0 = vld [vmem:[#allocation5 + $0x4f4] ss:$24 sps:$4 sm:$0xff]  }
 0x128   :  { %2194 = vmatpush2.bf16.msra.mxu1 %v4925_v1  ;;  %v5018_v1 = vld [vmem:[#allocation5 + $0x1f0] ss:$24 sps:$4 sm:$0xff]  }
 0x129   :  { %2195 = vmatprep.subr.bf16.mxu1 %v4933_v2  ;;  %v5026_v2 = vld [vmem:[#allocation5 + $0x1c4] ss:$24 sps:$4 sm:$0xff]  }
 0x12a   :  { %2153 = vmatpush2.bf16.msra.mxu0 %v4928_v3  ;;  %v5021_v3 = vld [vmem:[#allocation5 + $0x4f0] ss:$24 sps:$4 sm:$0xff]  }
 0x12b   :  { %2154 = vmatprep.subr.bf16.mxu0 %v4936_v5  ;;  %v452_v5 = vlaneseq }
 0x12c   :  { %2196 = vmatpush2.bf16.msra.mxu1 %v4931_v6  ;;  %v5029_v6 = vld [vmem:[#allocation5 + $0x4c4] ss:$24 sps:$4 sm:$0xff]  }
 0x12d   :  { %2197 = vmatprep.subr.bf16.mxu1 %v4939_v8  ;;  %v5024_v8 = vld [vmem:[#allocation5 + $0x1c0] ss:$24 sps:$4 sm:$0xff]  }
 0x12e   :  { %2155 = vmatpush2.bf16.msra.mxu0 %v4934_v9  ;;  %v5032_v9 = vld [vmem:[#allocation5 + $0x194] ss:$24 sps:$4 sm:$0xff]  }
 0x12f   :  { %2210 = vmatprep.subr.bf16.mxu0 %v4942_v11  ;;  %v5027_v11 = vld [vmem:[#allocation5 + $0x4c0] ss:$24 sps:$4 sm:$0xff]  }
 0x130   :  { %2198 = vmatpush2.bf16.msra.mxu1 %v4937_v12  ;;  %v5759_v12 = vshrl.u32 %v452_v5, 7  ;;  %v5080_v5 = vld [vmem:[#allocation5 + $0x884] ss:$24 sps:$4 sm:$0xff]  }
 0x131   :  { %2157 = vmatmul.mubr.bf16.vlgmr.msra.gmra.mxu0 %v5744_v7  ;;  %2253 = vmatprep.subr.bf16.mxu1 %v4945_v13  ;;  %v4960_v7 = vld [vmem:[#allocation5 + $0xd4] ss:$24 sps:$4 sm:$0xff]  }
 0x132   :  { %2211 = vmatpush1.bf16.msra.mxu0 %v4940_v14  ;;  %2242 = vmatprep.mubr.bf16.mxu0 %v5420_v19  ;;  %v5035_v13 = vld [vmem:[#allocation5 + $0x494] ss:$24 sps:$4 sm:$0xff]   ;;  %v5030_v14 = vld [vmem:[#allocation5 + $0x190] ss:$24 sps:$4 sm:$0xff]   ;;  %v5059_v19 = vld [vmem:[#allocation10 + $0x74] ss:$8 sps:$4 sm:$0xff]  }
 0x133   :  { %2200 = vmatmul.mubr.bf16.vlgmr.msra.gmra.mxu1 %v5751_v10  ;;  %2212 = vmatprep.subr.bf16.mxu0 %v4948_v15  ;;  %v4966_v10 = vld [vmem:[#allocation5 + $0xa4] ss:$24 sps:$4 sm:$0xff]  }
 0x134   :  { %2254 = vmatpush1.bf16.msra.mxu1 %v4943_v16  ;;  %2285 = vmatprep.mubr.bf16.mxu1 %v5421_v22  ;;  %v5761_v15 = vld [vmem:[#allocation7] sm:$0x3f]  ;;  %v5041_v22 = vld [vmem:[#allocation5 + $0x734] ss:$24 sps:$4 sm:$0xff]  }
 0x135   :  { %2255 = vmatprep.subr.bf16.mxu1 %v4951_v17  ;;  %v5038_v16 = vld [vmem:[#allocation5 + $0x764] ss:$24 sps:$4 sm:$0xff]   ;;  %v5033_v17 = vld [vmem:[#allocation5 + $0x490] ss:$24 sps:$4 sm:$0xff]  }
 0x136   :  { %2213 = vmatpush1.bf16.msra.mxu0 %v4946_v18  ;;  %v454_v18 = vsub.s32 0, %v5759_v12 }
 0x137   :  { %2214 = vmatprep.subr.bf16.mxu0 %v4954_v20  ;;  %v5036_v20 = vld [vmem:[#allocation5 + $0x760] ss:$24 sps:$4 sm:$0xff]  }
 0x138   :  { %2256 = vmatpush1.bf16.msra.mxu1 %v4949_v21  ;;  %v458_v21 = vsub.s32 1, %v5759_v12 }
 0x139   :  { %2257 = vmatprep.subr.bf16.mxu1 %v4957_v23  ;;  %v5768_v23 = vrot.slane %v5761_v15, %v454_v18 }
 0x13a   :  { %2215 = vmatpush1.bf16.msra.mxu0 %v4952_v52  ;;  %v5057_v52 = vld [vmem:[#allocation10 + $0x70] ss:$8 sps:$4 sm:$0xff]  }
 0x13b   :  { %2216 = vmatprep.subr.bf16.mxu0 %v4960_v7  ;;  %v5065_v7 = vld [vmem:[#allocation10 + $0x64] ss:$8 sps:$4 sm:$0xff]  }
 0x13c   :  { %2258 = vmatpush1.bf16.msra.mxu1 %v4955_v4  ;;  %v5773_v4 = vrot.slane %v5761_v15, %v458_v21 }
 0x13d   :  { %2259 = vmatprep.subr.bf16.mxu1 %v4963_v24  ;;  %v5039_v24 = vld [vmem:[#allocation5 + $0x730] ss:$24 sps:$4 sm:$0xff]  }
 0x13e   :  { %2217 = vmatpush1.bf16.msra.mxu0 %v4958_v25 }
 0x13f   :  { %2218 = vmatprep.subr.bf16.mxu0 %v4966_v10  ;;  %v5422_v10 = vld [vmem:[#allocation3] ss:$24 sps:$4 sm:$0xff]  }
 0x140   :  { %2260 = vmatpush1.bf16.msra.mxu1 %v4961_v26  ;;  %v5044_v26 = vld [vmem:[#allocation5 + $0x704] ss:$24 sps:$4 sm:$0xff]  }
 0x141   :  { %2261 = vmatprep.subr.bf16.mxu1 %v4969_v27 }
 0x142   :  { %2219 = vmatpush1.bf16.msra.mxu0 %v4964_v28  ;;  %v5063_v28 = vld [vmem:[#allocation10 + $0x60] ss:$8 sps:$4 sm:$0xff]  }
 0x143   :  { %2220 = vmatprep.subr.bf16.mxu0 %v4972_v29  ;;  %v5423_v29 = vld [vmem:[#allocation3 + $0x14] ss:$24 sps:$4 sm:$0xff]  }
 0x144   :  { %2262 = vmatpush1.bf16.msra.mxu1 %v4967_v30 }
 0x145   :  { %2263 = vmatprep.subr.bf16.mxu1 %v4975_v31 }
 0x146   :  { %2221 = vmatpush1.bf16.msra.mxu0 %v4970_v32  ;;  %v5424_v32 = vld [vmem:[#allocation3 + $0x8] ss:$24 sps:$4 sm:$0xff]  }
 0x147   :  { %2222 = vmatprep.subr.bf16.mxu0 %v4978_v33  ;;  %v5071_v33 = vld [vmem:[#allocation10 + $0x54] ss:$8 sps:$4 sm:$0xff]  }
 0x148   :  { %2264 = vmatpush1.bf16.msra.mxu1 %v4973_v34 }
 0x149   :  { %2265 = vmatprep.subr.bf16.mxu1 %v4981_v35 }
 0x14a   :  { %2223 = vmatpush1.bf16.msra.mxu0 %v4976_v36  ;;  %v5042_v36 = vld [vmem:[#allocation5 + $0x700] ss:$24 sps:$4 sm:$0xff]  }
 0x14b   :  { %2224 = vmatprep.subr.bf16.mxu0 %v4984_v37 }
 0x14c   :  { %2266 = vmatpush1.bf16.msra.mxu1 %v4979_v38  ;;  %v5047_v38 = vld [vmem:[#allocation5 + $0x6d4] ss:$24 sps:$4 sm:$0xff]  }
 0x14d   :  { %2267 = vmatprep.subr.bf16.mxu1 %v4987_v39 }
 0x14e   :  { %2225 = vmatpush1.bf16.msra.mxu0 %v4982_v40  ;;  %v5069_v40 = vld [vmem:[#allocation10 + $0x50] ss:$8 sps:$4 sm:$0xff]  }
 0x14f   :  { %2226 = vmatprep.subr.bf16.mxu0 %v4990_v41  ;;  %v5077_v41 = vld [vmem:[#allocation10 + $0x44] ss:$8 sps:$4 sm:$0xff]  }
 0x150   :  { %2268 = vmatpush1.bf16.msra.mxu1 %v4985_v42  ;;  %v5045_v42 = vld [vmem:[#allocation5 + $0x6d0] ss:$24 sps:$4 sm:$0xff]  }
 0x151   :  { %2269 = vmatprep.subr.bf16.mxu1 %v4993_v43  ;;  %v5050_v43 = vld [vmem:[#allocation5 + $0x6a4] ss:$24 sps:$4 sm:$0xff]  }
 0x152   :  { %2227 = vmatpush2.bf16.msra.mxu0 %v4988_v44  ;;  %v5075_v44 = vld [vmem:[#allocation10 + $0x40] ss:$8 sps:$4 sm:$0xff]  }
 0x153   :  { %2228 = vmatprep.subr.bf16.mxu0 %v4996_v45  ;;  %v5083_v45 = vld [vmem:[#allocation10 + $0x34] ss:$8 sps:$4 sm:$0xff]  }
 0x154   :  { %2270 = vmatpush2.bf16.msra.mxu1 %v4991_v46  ;;  %v5048_v46 = vld [vmem:[#allocation5 + $0x6a0] ss:$24 sps:$4 sm:$0xff]  }
 0x155   :  { %2271 = vmatprep.subr.bf16.mxu1 %v4999_v47  ;;  %v5053_v47 = vld [vmem:[#allocation5 + $0x674] ss:$24 sps:$4 sm:$0xff]  }
 0x156   :  { %2229 = vmatpush2.bf16.msra.mxu0 %v4994_v48  ;;  %v5081_v48 = vld [vmem:[#allocation10 + $0x30] ss:$8 sps:$4 sm:$0xff]  }
 0x157   :  { %2230 = vmatprep.subr.bf16.mxu0 %v5002_v49  ;;  %v5089_v49 = vld [vmem:[#allocation10 + $0x24] ss:$8 sps:$4 sm:$0xff]  }
 0x158   :  { %2272 = vmatpush2.bf16.msra.mxu1 %v4997_v50  ;;  %v5051_v50 = vld [vmem:[#allocation5 + $0x670] ss:$24 sps:$4 sm:$0xff]  }
 0x159   :  { %2273 = vmatprep.subr.bf16.mxu1 %v5005_v53  ;;  %v5087_v53 = vld [vmem:[#allocation10 + $0x20] ss:$8 sps:$4 sm:$0xff]  }
 0x15a   :  { %2231 = vmatpush2.bf16.msra.mxu0 %v5000_v51  ;;  %v5056_v51 = vld [vmem:[#allocation5 + $0x644] ss:$24 sps:$4 sm:$0xff]  }
 0x15b   :  { %2232 = vmatprep.subr.bf16.mxu0 %v5008_v54  ;;  %v5095_v54 = vld [vmem:[#allocation10 + $0x14] ss:$8 sps:$4 sm:$0xff]  }
 0x15c   :  { %2274 = vmatpush2.bf16.msra.mxu1 %v5003_v55  ;;  %v5054_v55 = vld [vmem:[#allocation5 + $0x640] ss:$24 sps:$4 sm:$0xff]  }
 0x15d   :  { %2275 = vmatprep.subr.bf16.mxu1 %v5011_v56  ;;  %v5062_v56 = vld [vmem:[#allocation5 + $0x614] ss:$24 sps:$4 sm:$0xff]  }
 0x15e   :  { %2233 = vmatpush2.bf16.msra.mxu0 %v5006_v57  ;;  %v5093_v57 = vld [vmem:[#allocation10 + $0x10] ss:$8 sps:$4 sm:$0xff]  }
 0x15f   :  { %2234 = vmatprep.subr.bf16.mxu0 %v5014_v58  ;;  %v5101_v58 = vld [vmem:[#allocation10 + $0x4] ss:$8 sps:$4 sm:$0xff]  }
 0x160   :  { %2276 = vmatpush2.bf16.msra.mxu1 %v5009_v59  ;;  %v5060_v59 = vld [vmem:[#allocation5 + $0x610] ss:$24 sps:$4 sm:$0xff]  }
 0x161   :  { %2277 = vmatprep.subr.bf16.mxu1 %v5017_v60  ;;  %v5068_v60 = vld [vmem:[#allocation5 + $0x8e4] ss:$24 sps:$4 sm:$0xff]  }
 0x162   :  { %2235 = vmatpush2.bf16.msra.mxu0 %v5012_v61  ;;  %v5099_v61 = vld [vmem:[#allocation10] ss:$8 sps:$4 sm:$0xff]  }
 0x163   :  { %2236 = vmatprep.subr.bf16.mxu0 %v5020_v62  ;;  %v5107_v62 = vld [vmem:[#allocation10 + $0xf4] ss:$8 sps:$4 sm:$0xff]  }
 0x164   :  { %2278 = vmatpush2.bf16.msra.mxu1 %v5015_v63  ;;  %v5066_v63 = vld [vmem:[#allocation5 + $0x8e0] ss:$24 sps:$4 sm:$0xff]  }
 0x165   :  { %2279 = vmatprep.subr.bf16.mxu1 %v5023_v0  ;;  %v5074_v0 = vld [vmem:[#allocation5 + $0x8b4] ss:$24 sps:$4 sm:$0xff]  }
 0x166   :  { %2237 = vmatpush2.bf16.msra.mxu0 %v5018_v1  ;;  %v5105_v1 = vld [vmem:[#allocation10 + $0xf0] ss:$8 sps:$4 sm:$0xff]  }
 0x167   :  { %2238 = vmatprep.subr.bf16.mxu0 %v5026_v2  ;;  %v5113_v2 = vld [vmem:[#allocation10 + $0xe4] ss:$8 sps:$4 sm:$0xff]  }
 0x168   :  { %2280 = vmatpush2.bf16.msra.mxu1 %v5021_v3  ;;  %v5072_v3 = vld [vmem:[#allocation5 + $0x8b0] ss:$24 sps:$4 sm:$0xff]  }
 0x169   :  { %2281 = vmatprep.subr.bf16.mxu1 %v5029_v6  ;;  %v5111_v6 = vld [vmem:[#allocation10 + $0xe0] ss:$8 sps:$4 sm:$0xff]  }
 0x16a   :  { %2239 = vmatpush2.bf16.msra.mxu0 %v5024_v8  ;;  %v5116_v8 = vld [vmem:[#allocation10 + $0xd4] ss:$8 sps:$4 sm:$0xff]  }
 0x16b   :  { %2240 = vmatprep.subr.bf16.mxu0 %v5032_v9  ;;  %v5078_v9 = vld [vmem:[#allocation5 + $0x880] ss:$24 sps:$4 sm:$0xff]  }
 0x16c   :  { %2282 = vmatpush2.bf16.msra.mxu1 %v5027_v11  ;;  %v5086_v11 = vld [vmem:[#allocation5 + $0x854] ss:$24 sps:$4 sm:$0xff]  }
 0x16d   :  { %2283 = vmatprep.subr.bf16.mxu1 %v5035_v13  ;;  %v5114_v13 = vld [vmem:[#allocation10 + $0xd0] ss:$8 sps:$4 sm:$0xff]  }
 0x16e   :  { %2241 = vmatpush2.bf16.msra.mxu0 %v5030_v14  ;;  %v5119_v14 = vld [vmem:[#allocation10 + $0xc4] ss:$8 sps:$4 sm:$0xff]  }
 0x16f   :  { %2296 = vmatprep.subr.bf16.mxu0 %v5038_v16  ;;  %v5084_v16 = vld [vmem:[#allocation5 + $0x850] ss:$24 sps:$4 sm:$0xff]  }
 0x170   :  { %2284 = vmatpush2.bf16.msra.mxu1 %v5033_v17  ;;  %v5092_v17 = vld [vmem:[#allocation5 + $0x824] ss:$24 sps:$4 sm:$0xff]  }
 0x171   :  { %v1986_v25 = vpop.f32.mrf.mxu0  ;;  %2243 = vmatmul.mubr.bf16.vlgmr.msra.gmra.mxu0 %v5422_v10  ;;  %3035 = vmatprep.subr.bf16.mxu1 %v5059_v19  ;;  %v5117_v19 = vld [vmem:[#allocation10 + $0xc0] ss:$8 sps:$4 sm:$0xff]  }
 0x172   :  { %v1987_v27 = vadd.f32 %v1986_v25, %v5768_v23  ;;  %2297 = vmatpush1.bf16.msra.mxu0 %v5036_v20  ;;  %2328 = vmatprep.mubr.bf16.mxu0 %v5423_v29  ;;  %v2029_v31 = vpop.f32.mrf.mxu1  ;;  %v5122_v20 = vld [vmem:[#allocation10 + $0xb4] ss:$8 sps:$4 sm:$0xff]   ;;  %v5096_v25 = vld [vmem:[#allocation5 + $0x7f0] ss:$24 sps:$4 sm:$0xff]   ;;  %v5110_v29 = vld [vmem:[#allocation5 + $0x794] ss:$24 sps:$4 sm:$0xff]  }
 0x173   :  { %v1988_v30 = vpop.f32.mrf.mxu0  ;;  %2286 = vmatmul.mubr.bf16.vlgmr.msra.gmra.mxu1 %v5424_v32  ;;  %2298 = vmatprep.subr.bf16.mxu0 %v5041_v22  ;;  %v5090_v22 = vld [vmem:[#allocation5 + $0x820] ss:$24 sps:$4 sm:$0xff]   ;;  %v5104_v10 = vld [vmem:[#allocation5 + $0x7c4] ss:$24 sps:$4 sm:$0xff]   ;;  %v5108_v32 = vld [vmem:[#allocation5 + $0x790] ss:$24 sps:$4 sm:$0xff]  }
 0x174   :  { %v1989_v34 = vadd.f32 %v1988_v30, %v5773_v4  ;;  %v5777_v35 = vadd.f32 %v2029_v31, %v1987_v27  ;;  %3036 = vmatpush1.bf16.msra.mxu1 %v5057_v52  ;;  %v2031_v37 = vpop.f32.mrf.mxu1  ;;  %v5098_v52 = vld [vmem:[#allocation5 + $0x7f4] ss:$24 sps:$4 sm:$0xff]   ;;  %v5128_v27 = vld [vmem:[#allocation10 + $0x94] ss:$8 sps:$4 sm:$0xff]  }
 0x175   :  { %3037 = vmatprep.subr.bf16.mxu1 %v5065_v7  ;;  %v5120_v7 = vld [vmem:[#allocation10 + $0xb0] ss:$8 sps:$4 sm:$0xff]   ;;  %v5131_v31 = vld [vmem:[#allocation10 + $0x84] ss:$8 sps:$4 sm:$0xff]  }
 0x176   :  { %v5779_v39 = vadd.f32 %v2031_v37, %v1989_v34  ;;  %2299 = vmatpush1.bf16.msra.mxu0 %v5039_v24  ;;  %v5125_v24 = vld [vmem:[#allocation10 + $0xa4] ss:$8 sps:$4 sm:$0xff]   ;;  %v5126_v30 = vld [vmem:[#allocation10 + $0x90] ss:$8 sps:$4 sm:$0xff]   ;;  %v5134_v34 = vld [vmem:[#allocation10 + $0x174] ss:$8 sps:$4 sm:$0xff]  }
 0x177   :  { %2300 = vmatprep.subr.bf16.mxu0 %v5044_v26  ;;  %v5123_v26 = vld [vmem:[#allocation10 + $0xa0] ss:$8 sps:$4 sm:$0xff]   ;;  %v462_v37 = vsub.s32 2, %v5759_v12 }
 0x178   :  { %3038 = vmatpush1.bf16.msra.mxu1 %v5063_v28  ;;  %v5102_v28 = vld [vmem:[#allocation5 + $0x7c0] ss:$24 sps:$4 sm:$0xff]  }
 0x179   :  { %3039 = vmatprep.subr.bf16.mxu1 %v5071_v33  ;;  %v1990_v33 = vpop.f32.mrf.mxu0 }
 0x17a   :  { %2301 = vmatpush1.bf16.msra.mxu0 %v5042_v36  ;;  %v5129_v36 = vld [vmem:[#allocation10 + $0x80] ss:$8 sps:$4 sm:$0xff]  }
 0x17b   :  { %2302 = vmatprep.subr.bf16.mxu0 %v5047_v38  ;;  %v2033_v38 = vpop.f32.mrf.mxu1 }
 0x17c   :  { %3040 = vmatpush1.bf16.msra.mxu1 %v5069_v40  ;;  %v5132_v40 = vld [vmem:[#allocation10 + $0x170] ss:$8 sps:$4 sm:$0xff]  }
 0x17d   :  { %3041 = vmatprep.subr.bf16.mxu1 %v5077_v41  ;;  %v466_v41 = vsub.s32 3, %v5759_v12 }
 0x17e   :  { %2303 = vmatpush1.bf16.msra.mxu0 %v5045_v42  ;;  %v1992_v42 = vpop.f32.mrf.mxu0 }
 0x17f   :  { %2304 = vmatprep.subr.bf16.mxu0 %v5050_v43  ;;  %v5137_v43 = vld [vmem:[#allocation10 + $0x164] ss:$8 sps:$4 sm:$0xff]  }
 0x180   :  { %3042 = vmatpush1.bf16.msra.mxu1 %v5075_v44  ;;  %v1991_v44 = vadd.f32 %v1990_v33, %v5768_v23  ;;  %v5140_v23 = vld [vmem:[#allocation10 + $0x154] ss:$8 sps:$4 sm:$0xff]  }
 0x181   :  { %3043 = vmatprep.subr.bf16.mxu1 %v5083_v45  ;;  %v5785_v45 = vrot.slane %v5761_v15, %v462_v37  ;;  %v5254_v33 = vld [vmem:[#allocation10 + $0x234] ss:$8 sps:$4 sm:$0xff]  }
 0x182   :  { %2305 = vmatpush1.bf16.msra.mxu0 %v5048_v46  ;;  %v2035_v46 = vpop.f32.mrf.mxu1  ;;  %v5170_v37 = vld [vmem:[#allocation10 + $0x1b4] ss:$8 sps:$4 sm:$0xff]  }
 0x183   :  { %2306 = vmatprep.subr.bf16.mxu0 %v5053_v47 }
 0x184   :  { %3044 = vmatpush1.bf16.msra.mxu1 %v5081_v48  ;;  %v5425_v48 = vld [vmem:[#allocation3 + $0x10] ss:$24 sps:$4 sm:$0xff]  }
 0x185   :  { %3045 = vmatprep.subr.bf16.mxu1 %v5089_v49  ;;  %v1993_v49 = vadd.f32 %v1992_v42, %v5773_v4  ;;  %v5173_v42 = vld [vmem:[#allocation10 + $0x1a4] ss:$8 sps:$4 sm:$0xff]  }
 0x186   :  { %2307 = vmatpush1.bf16.msra.mxu0 %v5051_v50 }
 0x187   :  { %2308 = vmatprep.subr.bf16.mxu0 %v5056_v51  ;;  %v5135_v51 = vld [vmem:[#allocation10 + $0x160] ss:$8 sps:$4 sm:$0xff]  }
 0x188   :  { %3046 = vmatpush1.bf16.msra.mxu1 %v5087_v53  ;;  %v5792_v53 = vrot.slane %v5761_v15, %v466_v41  ;;  %v5258_v41 = vld [vmem:[#allocation10 + $0x220] ss:$8 sps:$4 sm:$0xff]  }
 0x189   :  { %3047 = vmatprep.subr.bf16.mxu1 %v5095_v54 }
 0x18a   :  { %2309 = vmatpush1.bf16.msra.mxu0 %v5054_v55 }
 0x18b   :  { %2310 = vmatprep.subr.bf16.mxu0 %v5062_v56  ;;  %v2034_v56 = vadd.f32 %v2033_v38, %v1991_v44  ;;  %v5260_v38 = vld [vmem:[#allocation10 + $0x224] ss:$8 sps:$4 sm:$0xff]   ;;  %v5171_v44 = vld [vmem:[#allocation10 + $0x1a0] ss:$8 sps:$4 sm:$0xff]  }
 0x18c   :  { %3048 = vmatpush1.bf16.msra.mxu1 %v5093_v57 }
 0x18d   :  { %3049 = vmatprep.subr.bf16.mxu1 %v5101_v58 }
 0x18e   :  { %2311 = vmatpush1.bf16.msra.mxu0 %v5060_v59 }
 0x18f   :  { %2312 = vmatprep.subr.bf16.mxu0 %v5068_v60 }
 0x190   :  { %3050 = vmatpush1.bf16.msra.mxu1 %v5099_v61  ;;  %v5138_v61 = vld [vmem:[#allocation10 + $0x150] ss:$8 sps:$4 sm:$0xff]  }
 0x191   :  { %3051 = vmatprep.subr.bf16.mxu1 %v5107_v62 }
 0x192   :  { %2313 = vmatpush2.bf16.msra.mxu0 %v5066_v63  ;;  %v5143_v63 = vld [vmem:[#allocation10 + $0x144] ss:$8 sps:$4 sm:$0xff]  }
 0x193   :  { %2314 = vmatprep.subr.bf16.mxu0 %v5074_v0 }
 0x194   :  { %3052 = vmatpush2.bf16.msra.mxu1 %v5105_v1  ;;  %v5146_v1 = vld [vmem:[#allocation10 + $0x134] ss:$8 sps:$4 sm:$0xff]  }
 0x195   :  { %3053 = vmatprep.subr.bf16.mxu1 %v5113_v2  ;;  %v5144_v2 = vld [vmem:[#allocation10 + $0x130] ss:$8 sps:$4 sm:$0xff]  }
 0x196   :  { %2315 = vmatpush2.bf16.msra.mxu0 %v5072_v3  ;;  %v5149_v3 = vld [vmem:[#allocation10 + $0x124] ss:$8 sps:$4 sm:$0xff]  }
 0x197   :  { %2316 = vmatprep.subr.bf16.mxu0 %v5080_v5  ;;  %v5147_v5 = vld [vmem:[#allocation10 + $0x120] ss:$8 sps:$4 sm:$0xff]  }
 0x198   :  { %3054 = vmatpush2.bf16.msra.mxu1 %v5111_v6  ;;  %v5152_v6 = vld [vmem:[#allocation10 + $0x114] ss:$8 sps:$4 sm:$0xff]  }
 0x199   :  { %3055 = vmatprep.subr.bf16.mxu1 %v5116_v8 }
 0x19a   :  { %2317 = vmatpush2.bf16.msra.mxu0 %v5078_v9  ;;  %v5150_v9 = vld [vmem:[#allocation10 + $0x110] ss:$8 sps:$4 sm:$0xff]  }
 0x19b   :  { %2318 = vmatprep.subr.bf16.mxu0 %v5086_v11 }
 0x19c   :  { %3056 = vmatpush2.bf16.msra.mxu1 %v5114_v13  ;;  %v5155_v13 = vld [vmem:[#allocation10 + $0x104] ss:$8 sps:$4 sm:$0xff]  }
 0x19d   :  { %3057 = vmatprep.subr.bf16.mxu1 %v5119_v14 }
 0x19e   :  { %2319 = vmatpush2.bf16.msra.mxu0 %v5084_v16 }
 0x19f   :  { %2320 = vmatprep.subr.bf16.mxu0 %v5092_v17  ;;  %v5230_v17 = vld [vmem:[#allocation10 + $0x274] ss:$8 sps:$4 sm:$0xff]  }
 0x1a0   :  { %3058 = vmatpush2.bf16.msra.mxu1 %v5117_v19  ;;  %v5153_v19 = vld [vmem:[#allocation10 + $0x100] ss:$8 sps:$4 sm:$0xff]  }
 0x1a1   :  { %3059 = vmatprep.subr.bf16.mxu1 %v5122_v20  ;;  %v5228_v20 = vld [vmem:[#allocation10 + $0x270] ss:$8 sps:$4 sm:$0xff]  }
 0x1a2   :  { %2321 = vmatpush2.bf16.msra.mxu0 %v5090_v22  ;;  %v5158_v22 = vld [vmem:[#allocation10 + $0x1f4] ss:$8 sps:$4 sm:$0xff]  }
 0x1a3   :  { %2322 = vmatprep.subr.bf16.mxu0 %v5098_v52  ;;  %v5236_v52 = vld [vmem:[#allocation10 + $0x264] ss:$8 sps:$4 sm:$0xff]  }
 0x1a4   :  { %3060 = vmatpush2.bf16.msra.mxu1 %v5120_v7  ;;  %v5156_v7 = vld [vmem:[#allocation10 + $0x1f0] ss:$8 sps:$4 sm:$0xff]  }
 0x1a5   :  { %3061 = vmatprep.subr.bf16.mxu1 %v5125_v24  ;;  %v5234_v24 = vld [vmem:[#allocation10 + $0x260] ss:$8 sps:$4 sm:$0xff]  }
 0x1a6   :  { %2323 = vmatpush2.bf16.msra.mxu0 %v5096_v25  ;;  %v5161_v25 = vld [vmem:[#allocation10 + $0x1e4] ss:$8 sps:$4 sm:$0xff]  }
 0x1a7   :  { %2324 = vmatprep.subr.bf16.mxu0 %v5104_v10  ;;  %v5242_v10 = vld [vmem:[#allocation10 + $0x254] ss:$8 sps:$4 sm:$0xff]  }
 0x1a8   :  { %3062 = vmatpush2.bf16.msra.mxu1 %v5123_v26  ;;  %v5159_v26 = vld [vmem:[#allocation10 + $0x1e0] ss:$8 sps:$4 sm:$0xff]  }
 0x1a9   :  { %3063 = vmatprep.subr.bf16.mxu1 %v5128_v27  ;;  %v5240_v27 = vld [vmem:[#allocation10 + $0x250] ss:$8 sps:$4 sm:$0xff]  }
 0x1aa   :  { %2325 = vmatpush2.bf16.msra.mxu0 %v5102_v28  ;;  %v5164_v28 = vld [vmem:[#allocation10 + $0x1d4] ss:$8 sps:$4 sm:$0xff]  }
 0x1ab   :  { %2326 = vmatprep.subr.bf16.mxu0 %v5110_v29  ;;  %v5248_v29 = vld [vmem:[#allocation10 + $0x244] ss:$8 sps:$4 sm:$0xff]  }
 0x1ac   :  { %3064 = vmatpush2.bf16.msra.mxu1 %v5126_v30  ;;  %v5162_v30 = vld [vmem:[#allocation10 + $0x1d0] ss:$8 sps:$4 sm:$0xff]  }
 0x1ad   :  { %3065 = vmatprep.subr.bf16.mxu1 %v5131_v31  ;;  %v5246_v31 = vld [vmem:[#allocation10 + $0x240] ss:$8 sps:$4 sm:$0xff]  }
 0x1ae   :  { %2327 = vmatpush2.bf16.msra.mxu0 %v5108_v32  ;;  %v5167_v32 = vld [vmem:[#allocation10 + $0x1c4] ss:$8 sps:$4 sm:$0xff]  }
 0x1af   :  { %3076 = vmatprep.subr.bf16.mxu0 %v5134_v34  ;;  %v5165_v34 = vld [vmem:[#allocation10 + $0x1c0] ss:$8 sps:$4 sm:$0xff]  }
 0x1b0   :  { %3066 = vmatpush2.bf16.msra.mxu1 %v5129_v36  ;;  %v5252_v36 = vld [vmem:[#allocation10 + $0x230] ss:$8 sps:$4 sm:$0xff]  }
 0x1b1   :  { %v2072_v47 = vpop.f32.mrf.mxu0  ;;  %2329 = vmatmul.mubr.bf16.vlgmr.msra.gmra.mxu0 %v5425_v48  ;;  %3117 = vmatprep.subr.bf16.mxu1 %v5230_v17  ;;  %v5272_v48 = vld [vmem:[#allocation10 + $0x204] ss:$8 sps:$4 sm:$0xff]  }
 0x1b2   :  { %v5789_v50 = vadd.f32 %v2072_v47, %v5777_v35  ;;  %3077 = vmatpush1.bf16.msra.mxu0 %v5132_v40  ;;  %v2036_v35 = vadd.f32 %v2035_v46, %v1993_v49  ;;  %v5168_v40 = vld [vmem:[#allocation10 + $0x1b0] ss:$8 sps:$4 sm:$0xff]   ;;  %v5176_v47 = vld [vmem:[#allocation10 + $0x194] ss:$8 sps:$4 sm:$0xff]  }
 0x1b3   :  { %v2074_v54 = vpop.f32.mrf.mxu0  ;;  %3078 = vmatprep.subr.bf16.mxu0 %v5137_v43  ;;  %v2115_v55 = vpop.f32.mrf.mxu1  ;;  %v5266_v43 = vld [vmem:[#allocation10 + $0x214] ss:$8 sps:$4 sm:$0xff]   ;;  %v5264_v46 = vld [vmem:[#allocation10 + $0x210] ss:$8 sps:$4 sm:$0xff]  }
 0x1b4   :  { %v5795_v57 = vadd.f32 %v2074_v54, %v5779_v39  ;;  %v5798_v58 = vadd.f32 %v2115_v55, %v5785_v45  ;;  %v5141_v39 = vld [vmem:[#allocation10 + $0x140] ss:$8 sps:$4 sm:$0xff]   ;;  %v5174_v49 = vld [vmem:[#allocation10 + $0x190] ss:$8 sps:$4 sm:$0xff]   ;;  %v5179_v54 = vld [vmem:[#allocation10 + $0x184] ss:$8 sps:$4 sm:$0xff]  }
 0x1b5   :  { %v2076_v4 = vpop.f32.mrf.mxu0  ;;  %v2117_v59 = vpop.f32.mrf.mxu1  ;;  %v5177_v55 = vld [vmem:[#allocation10 + $0x180] ss:$8 sps:$4 sm:$0xff]  }
 0x1b6   :  { %v2077_v60 = vadd.f32 %v2076_v4, %v2034_v56  ;;  %3079 = vmatpush1.bf16.msra.mxu0 %v5135_v51  ;;  %v5801_v15 = vadd.f32 %v2117_v59, %v5792_v53  ;;  %v5270_v51 = vld [vmem:[#allocation10 + $0x200] ss:$8 sps:$4 sm:$0xff]   ;;  %v5276_v56 = vld [vmem:[#allocation10 + $0x2f0] ss:$8 sps:$4 sm:$0xff]   ;;  %v5182_v59 = vld [vmem:[#allocation8 + $0x74] ss:$8 sps:$4 sm:$0xff]  }
 0x1b7   :  { %v2078_v62 = vpop.f32.mrf.mxu0  ;;  %3080 = vmatprep.subr.bf16.mxu0 %v5140_v23  ;;  %v5278_v23 = vld [vmem:[#allocation10 + $0x2f4] ss:$8 sps:$4 sm:$0xff]   ;;  %v2119_v4 = vpop.f32.mrf.mxu1 }
 0x1b8   :  { %v2079_v0 = vadd.f32 %v2078_v62, %v2036_v35  ;;  %5392 = vtanh.f32 %v2077_v60  ;;  %v5284_v35 = vld [vmem:[#allocation10 + $0x2e4] ss:$8 sps:$4 sm:$0xff]   ;;  %v5282_v60 = vld [vmem:[#allocation10 + $0x2e0] ss:$8 sps:$4 sm:$0xff]  }
 0x1ba   :  { %5394 = vtanh.f32 %v2079_v0  ;;  %3081 = vmatpush1.bf16.msra.mxu0 %v5138_v61  ;;  %v2121_v61 = vpop.f32.mrf.mxu1 }
 0x1bb   :  { %3082 = vmatprep.subr.bf16.mxu0 %v5143_v63  ;;  %v5290_v63 = vld [vmem:[#allocation10 + $0x2d4] ss:$8 sps:$4 sm:$0xff]   ;;  %5396 = vtanh.f32 %v5795_v57 }
 0x1be   :  { %3083 = vmatpush1.bf16.msra.mxu0 %v5141_v39  ;;  %v5288_v39 = vld [vmem:[#allocation10 + $0x2d0] ss:$8 sps:$4 sm:$0xff]  }
 0x1bf   :  { %3084 = vmatprep.subr.bf16.mxu0 %v5146_v1 }
 0x1c2   :  { %3085 = vmatpush1.bf16.msra.mxu0 %v5144_v2 }
 0x1c3   :  { %3086 = vmatprep.subr.bf16.mxu0 %v5149_v3  ;;  %v2120_v3 = vadd.f32 %v2119_v4, %v5785_v45  ;;  %v5207_v4 = vld [vmem:[#allocation8 + $0xe0] ss:$8 sps:$4 sm:$0xff]  }
 0x1c5   :  { %v5393_v8 = vpop.eup %5392 }
 0x1c6   :  { %3087 = vmatpush1.bf16.msra.mxu0 %v5147_v5  ;;  %v2357_v16 = vpack.c.bf16 %v5393_v8, %v5393_v8 }
 0x1c7   :  { %v5395_v11 = vpop.eup %5394  ;;  %3088 = vmatprep.subr.bf16.mxu0 %v5152_v6 }
 0x1c8   :  { %v2358_v14 = vpack.c.bf16 %v5395_v11, %v5395_v11  ;;  %v5296_v11 = vld [vmem:[#allocation10 + $0x2c4] ss:$8 sps:$4 sm:$0xff]  }
 0x1ca   :  { %3067 = vmatprep.mubr.bf16.mxu1 %v2358_v14  ;;  %3089 = vmatpush1.bf16.msra.mxu0 %v5150_v9 }
 0x1cb   :  { %3068 = vmatmul.mubr.bf16.vlgmr.msra.gmra.mxu1 %v2357_v16  ;;  %3090 = vmatprep.subr.bf16.mxu0 %v5155_v13  ;;  %v2122_v13 = vadd.f32 %v2121_v61, %v5792_v53  ;;  %v5308_v53 = vld [vmem:[#allocation10 + $0x2a4] ss:$8 sps:$4 sm:$0xff]   ;;  %v5213_v61 = vld [vmem:[#allocation8 + $0xc0] ss:$8 sps:$4 sm:$0xff]  }
 0x1cc   :  { %3118 = vmatpush1.bf16.msra.mxu1 %v5228_v20 }
 0x1cd   :  { %3119 = vmatprep.subr.bf16.mxu1 %v5236_v52 }
 0x1ce   :  { %3091 = vmatpush1.bf16.msra.mxu0 %v5153_v19 }
 0x1cf   :  { %3092 = vmatprep.subr.bf16.mxu0 %v5158_v22 }
 0x1d0   :  { %3120 = vmatpush1.bf16.msra.mxu1 %v5234_v24  ;;  %v5306_v24 = vld [vmem:[#allocation10 + $0x2a0] ss:$8 sps:$4 sm:$0xff]  }
 0x1d1   :  { %3121 = vmatprep.subr.bf16.mxu1 %v5242_v10  ;;  %v5312_v10 = vld [vmem:[#allocation10 + $0x290] ss:$8 sps:$4 sm:$0xff]  }
 0x1d2   :  { %3093 = vmatpush2.bf16.msra.mxu0 %v5156_v7  ;;  %v5300_v7 = vld [vmem:[#allocation10 + $0x2b0] ss:$8 sps:$4 sm:$0xff]  }
 0x1d3   :  { %3094 = vmatprep.subr.bf16.mxu0 %v5161_v25  ;;  %v5314_v25 = vld [vmem:[#allocation10 + $0x294] ss:$8 sps:$4 sm:$0xff]  }
 0x1d4   :  { %3122 = vmatpush1.bf16.msra.mxu1 %v5240_v27  ;;  %v5318_v27 = vld [vmem:[#allocation10 + $0x280] ss:$8 sps:$4 sm:$0xff]  }
 0x1d5   :  { %3123 = vmatprep.subr.bf16.mxu1 %v5248_v29 }
 0x1d6   :  { %3095 = vmatpush2.bf16.msra.mxu0 %v5159_v26  ;;  %v5320_v26 = vld [vmem:[#allocation10 + $0x284] ss:$8 sps:$4 sm:$0xff]  }
 0x1d7   :  { %3096 = vmatprep.subr.bf16.mxu0 %v5164_v28  ;;  %v5397_v28 = vpop.eup %5396 }
 0x1d8   :  { %3124 = vmatpush1.bf16.msra.mxu1 %v5246_v31 }
 0x1d9   :  { %3125 = vmatprep.subr.bf16.mxu1 %v5254_v33 }
 0x1da   :  { %3097 = vmatpush2.bf16.msra.mxu0 %v5162_v30  ;;  %v5326_v30 = vld [vmem:[#allocation8 + $0x174] ss:$8 sps:$4 sm:$0xff]  }
 0x1db   :  { %3098 = vmatprep.subr.bf16.mxu0 %v5167_v32  ;;  %v5180_v32 = vld [vmem:[#allocation8 + $0x70] ss:$8 sps:$4 sm:$0xff]  }
 0x1dc   :  { %3126 = vmatpush1.bf16.msra.mxu1 %v5252_v36  ;;  %v2352_v36 = vpack.c.bf16 %v5397_v28, %v5397_v28 }
 0x1dd   :  { %3127 = vmatprep.subr.bf16.mxu1 %v5260_v38  ;;  %v5188_v38 = vld [vmem:[#allocation8 + $0x54] ss:$8 sps:$4 sm:$0xff]  }
 0x1de   :  { %3099 = vmatpush2.bf16.msra.mxu0 %v5165_v34  ;;  %v5185_v34 = vld [vmem:[#allocation8 + $0x64] ss:$8 sps:$4 sm:$0xff]  }
 0x1df   :  { %3100 = vmatprep.subr.bf16.mxu0 %v5170_v37  ;;  %v5183_v37 = vld [vmem:[#allocation8 + $0x60] ss:$8 sps:$4 sm:$0xff]  }
 0x1e0   :  { %3128 = vmatpush1.bf16.msra.mxu1 %v5258_v41  ;;  %v5191_v41 = vld [vmem:[#allocation8 + $0x44] ss:$8 sps:$4 sm:$0xff]  }
 0x1e1   :  { %3129 = vmatprep.subr.bf16.mxu1 %v5266_v43  ;;  %v5194_v43 = vld [vmem:[#allocation8 + $0x34] ss:$8 sps:$4 sm:$0xff]  }
 0x1e2   :  { %3101 = vmatpush2.bf16.msra.mxu0 %v5168_v40  ;;  %v5186_v40 = vld [vmem:[#allocation8 + $0x50] ss:$8 sps:$4 sm:$0xff]  }
 0x1e3   :  { %3102 = vmatprep.subr.bf16.mxu0 %v5173_v42  ;;  %v5189_v42 = vld [vmem:[#allocation8 + $0x40] ss:$8 sps:$4 sm:$0xff]  }
 0x1e4   :  { %3130 = vmatpush1.bf16.msra.mxu1 %v5264_v46  ;;  %v5197_v46 = vld [vmem:[#allocation8 + $0x24] ss:$8 sps:$4 sm:$0xff]  }
 0x1e5   :  { %3131 = vmatprep.subr.bf16.mxu1 %v5272_v48  ;;  %v5200_v48 = vld [vmem:[#allocation8 + $0x14] ss:$8 sps:$4 sm:$0xff]  }
 0x1e6   :  { %3103 = vmatpush2.bf16.msra.mxu0 %v5171_v44  ;;  %v5192_v44 = vld [vmem:[#allocation8 + $0x30] ss:$8 sps:$4 sm:$0xff]  }
 0x1e7   :  { %3104 = vmatprep.subr.bf16.mxu0 %v5176_v47  ;;  %v5195_v47 = vld [vmem:[#allocation8 + $0x20] ss:$8 sps:$4 sm:$0xff]  }
 0x1e8   :  { %3132 = vmatpush1.bf16.msra.mxu1 %v5270_v51  ;;  %v5203_v51 = vld [vmem:[#allocation8 + $0x4] ss:$8 sps:$4 sm:$0xff]  }
 0x1e9   :  { %3133 = vmatprep.subr.bf16.mxu1 %v5278_v23  ;;  %v5206_v23 = vld [vmem:[#allocation8 + $0xf4] ss:$8 sps:$4 sm:$0xff]  }
 0x1ea   :  { %3105 = vmatpush2.bf16.msra.mxu0 %v5174_v49  ;;  %v5198_v49 = vld [vmem:[#allocation8 + $0x10] ss:$8 sps:$4 sm:$0xff]  }
 0x1eb   :  { %3106 = vmatprep.subr.bf16.mxu0 %v5179_v54  ;;  %v5201_v54 = vld [vmem:[#allocation8] ss:$8 sps:$4 sm:$0xff]  }
 0x1ec   :  { %3134 = vmatpush2.bf16.msra.mxu1 %v5276_v56  ;;  %v5209_v56 = vld [vmem:[#allocation8 + $0xe4] ss:$8 sps:$4 sm:$0xff]  }
 0x1ed   :  { %3135 = vmatprep.subr.bf16.mxu1 %v5284_v35  ;;  %v5210_v35 = vld [vmem:[#allocation8 + $0xd0] ss:$8 sps:$4 sm:$0xff]  }
 0x1ee   :  { %3107 = vmatpush2.bf16.msra.mxu0 %v5177_v55  ;;  %v5204_v55 = vld [vmem:[#allocation8 + $0xf0] ss:$8 sps:$4 sm:$0xff]  }
 0x1ef   :  { %3638 = vmatprep.subr.bf16.mxu0 %v5182_v59  ;;  %v5212_v59 = vld [vmem:[#allocation8 + $0xd4] ss:$8 sps:$4 sm:$0xff]  }
 0x1f0   :  { %3136 = vmatpush2.bf16.msra.mxu1 %v5282_v60  ;;  %v5215_v60 = vld [vmem:[#allocation8 + $0xc4] ss:$8 sps:$4 sm:$0xff]  }
 0x1f1   :  { %v2158_v62 = vpop.f32.mrf.mxu0  ;;  %3137 = vmatprep.subr.bf16.mxu1 %v5290_v63  ;;  %v5216_v63 = vld [vmem:[#allocation8 + $0xb0] ss:$8 sps:$4 sm:$0xff]  }
 0x1f2   :  { %v2159_v0 = vadd.f32 %v2158_v62, %v5798_v58  ;;  %v5294_v58 = vld [vmem:[#allocation10 + $0x2c0] ss:$8 sps:$4 sm:$0xff]   ;;  %v5218_v62 = vld [vmem:[#allocation8 + $0xb4] ss:$8 sps:$4 sm:$0xff]  }
 0x1f3   :  { %v2160_v1 = vpop.f32.mrf.mxu0  ;;  %v2201_v2 = vpop.f32.mrf.mxu1 }
 0x1f4   :  { %v2161_v5 = vadd.f32 %v2160_v1, %v5801_v15  ;;  %v5806_v6 = vadd.f32 %v2201_v2, %v2159_v0  ;;  %3138 = vmatpush2.bf16.msra.mxu1 %v5288_v39  ;;  %v5302_v15 = vld [vmem:[#allocation10 + $0x2b4] ss:$8 sps:$4 sm:$0xff]   ;;  %v5221_v0 = vld [vmem:[#allocation8 + $0xa4] ss:$8 sps:$4 sm:$0xff]   ;;  %v5219_v39 = vld [vmem:[#allocation8 + $0xa0] ss:$8 sps:$4 sm:$0xff]  }
 0x1f5   :  { %v2162_v8 = vpop.f32.mrf.mxu0  ;;  %v2203_v9 = vpop.f32.mrf.mxu1  ;;  %3139 = vmatprep.subr.bf16.mxu1 %v5296_v11  ;;  %v5224_v1 = vld [vmem:[#allocation8 + $0x94] ss:$8 sps:$4 sm:$0xff]   ;;  %v5222_v2 = vld [vmem:[#allocation8 + $0x90] ss:$8 sps:$4 sm:$0xff]  }
 0x1f6   :  { %v2163_v14 = vadd.f32 %v2162_v8, %v2120_v3  ;;  %v5809_v16 = vadd.f32 %v2203_v9, %v2161_v5  ;;  %v5227_v3 = vld [vmem:[#allocation8 + $0x84] ss:$8 sps:$4 sm:$0xff]   ;;  %v5225_v5 = vld [vmem:[#allocation8 + $0x80] ss:$8 sps:$4 sm:$0xff]   ;;  %v5233_v8 = vld [vmem:[#allocation8 + $0x274] ss:$8 sps:$4 sm:$0xff]  }
 0x1f7   :  { %v2164_v17 = vpop.f32.mrf.mxu0  ;;  %v2205_v19 = vpop.f32.mrf.mxu1  ;;  %v5231_v11 = vld [vmem:[#allocation8 + $0x270] ss:$8 sps:$4 sm:$0xff]  }
 0x1f8   :  { %v2165_v20 = vadd.f32 %v2164_v17, %v2122_v13  ;;  %v2206_v22 = vadd.f32 %v2205_v19, %v2163_v14  ;;  %3140 = vmatpush2.bf16.msra.mxu1 %v5294_v58  ;;  %v5237_v14 = vld [vmem:[#allocation8 + $0x260] ss:$8 sps:$4 sm:$0xff]   ;;  %v5245_v58 = vld [vmem:[#allocation8 + $0x254] ss:$8 sps:$4 sm:$0xff]   ;;  %v5243_v17 = vld [vmem:[#allocation8 + $0x250] ss:$8 sps:$4 sm:$0xff]  }
 0x1f9   :  { %v2207_v45 = vpop.f32.mrf.mxu1  ;;  %3141 = vmatprep.subr.bf16.mxu1 %v5302_v15  ;;  %v5251_v19 = vld [vmem:[#allocation8 + $0x244] ss:$8 sps:$4 sm:$0xff]  }
 0x1fa   :  { %v2208_v52 = vadd.f32 %v2207_v45, %v2165_v20  ;;  %5398 = vtanh.f32 %v2206_v22  ;;  %v5249_v20 = vld [vmem:[#allocation8 + $0x240] ss:$8 sps:$4 sm:$0xff]   ;;  %v5257_v22 = vld [vmem:[#allocation8 + $0x234] ss:$8 sps:$4 sm:$0xff]   ;;  %v5255_v45 = vld [vmem:[#allocation8 + $0x230] ss:$8 sps:$4 sm:$0xff]  }
 0x1fb   :  { %v5263_v15 = vld [vmem:[#allocation8 + $0x224] ss:$8 sps:$4 sm:$0xff]  }
 0x1fc   :  { %5400 = vtanh.f32 %v2208_v52  ;;  %3142 = vmatpush2.bf16.msra.mxu1 %v5300_v7  ;;  %v5261_v52 = vld [vmem:[#allocation8 + $0x220] ss:$8 sps:$4 sm:$0xff]   ;;  %v5269_v7 = vld [vmem:[#allocation8 + $0x214] ss:$8 sps:$4 sm:$0xff]  }
 0x1fd   :  { %3143 = vmatprep.subr.bf16.mxu1 %v5308_v53  ;;  %5402 = vtanh.f32 %v5789_v50  ;;  %v5239_v50 = vld [vmem:[#allocation8 + $0x264] ss:$8 sps:$4 sm:$0xff]   ;;  %v5267_v53 = vld [vmem:[#allocation8 + $0x210] ss:$8 sps:$4 sm:$0xff]  }
 0x200   :  { %3144 = vmatpush2.bf16.msra.mxu1 %v5306_v24 }
 0x201   :  { %3145 = vmatprep.subr.bf16.mxu1 %v5314_v25  ;;  %v5275_v25 = vld [vmem:[#allocation8 + $0x204] ss:$8 sps:$4 sm:$0xff]  }
 0x204   :  { %3146 = vmatpush2.bf16.msra.mxu1 %v5312_v10  ;;  %v474_v10 = vsub.s32 5, %v5759_v12 }
 0x205   :  { %3147 = vmatprep.subr.bf16.mxu1 %v5320_v26  ;;  %v5273_v26 = vld [vmem:[#allocation8 + $0x200] ss:$8 sps:$4 sm:$0xff]  }
 0x207   :  { %v5399_v29 = vpop.eup %5398 }
 0x208   :  { %3148 = vmatpush2.bf16.msra.mxu1 %v5318_v27  ;;  %v2359_v33 = vpack.c.bf16 %v5399_v29, %v5399_v29  ;;  %v5281_v29 = vld [vmem:[#allocation8 + $0x2f4] ss:$8 sps:$4 sm:$0xff]  }
 0x209   :  { %v5401_v57 = vpop.eup %5400  ;;  %3679 = vmatprep.subr.bf16.mxu1 %v5326_v30  ;;  %v5426_v30 = vld [vmem:[#allocation7] sm:$0x3f] }
 0x20a   :  { %v2360_v31 = vpack.c.bf16 %v5401_v57, %v5401_v57  ;;  %v5403_v9 = vpop.eup %5402  ;;  %v470_v57 = vsub.s32 4, %v5759_v12  ;;  %v5389_v12 = vld [vmem:[%s5898_s8 + $0x10] sm:$0xff]  }
 0x20b   :  { %v2351_v13 = vpack.c.bf16 %v5403_v9, %v5403_v9  ;;  %v5315_v9 = vld [vmem:[#allocation8 + $0x290] ss:$8 sps:$4 sm:$0xff]  }
 0x20c   :  { %3108 = vmatprep.mubr.bf16.mxu0 %v2360_v31  ;;  %v475_v31 = vrot.slane %v5426_v30, %v474_v10  ;;  %v5332_v10 = vld [vmem:[#allocation8 + $0x154] ss:$8 sps:$4 sm:$0xff]  }
 0x20d   :  { %3109 = vmatmul.mubr.bf16.vlgmr.msra.gmra.mxu0 %v2359_v33 }
 0x20e   :  { %3639 = vmatpush1.bf16.msra.mxu0 %v5180_v32  ;;  %3670 = vmatprep.mubr.bf16.mxu0 %v2352_v36  ;;  %v5279_v32 = vld [vmem:[#allocation8 + $0x2f0] ss:$8 sps:$4 sm:$0xff]   ;;  %v5287_v36 = vld [vmem:[#allocation8 + $0x2e4] ss:$8 sps:$4 sm:$0xff]  }
 0x20f   :  { %3640 = vmatprep.subr.bf16.mxu0 %v5185_v34 }
 0x212   :  { %3641 = vmatpush1.bf16.msra.mxu0 %v5183_v37  ;;  %v471_v37 = vrot.slane %v5426_v30, %v470_v57  ;;  %v5333_v57 = vld [vmem:[#allocation8 + $0x140] ss:$8 sps:$4 sm:$0xff]   ;;  %v5338_v30 = vld [vmem:[#allocation8 + $0x134] ss:$8 sps:$4 sm:$0xff]  }
 0x213   :  { %3642 = vmatprep.subr.bf16.mxu0 %v5188_v38 }
 0x216   :  { %3643 = vmatpush1.bf16.msra.mxu0 %v5186_v40  ;;  %v5285_v40 = vld [vmem:[#allocation8 + $0x2e0] ss:$8 sps:$4 sm:$0xff]  }
 0x217   :  { %3644 = vmatprep.subr.bf16.mxu0 %v5191_v41 }
 0x21a   :  { %3645 = vmatpush1.bf16.msra.mxu0 %v5189_v42 }
 0x21b   :  { %3646 = vmatprep.subr.bf16.mxu0 %v5194_v43  ;;  %v5293_v43 = vld [vmem:[#allocation8 + $0x2d4] ss:$8 sps:$4 sm:$0xff]  }
 0x21e   :  { %3647 = vmatpush1.bf16.msra.mxu0 %v5192_v44 }
 0x21f   :  { %3648 = vmatprep.subr.bf16.mxu0 %v5197_v46 }
 0x222   :  { %3649 = vmatpush1.bf16.msra.mxu0 %v5195_v47 }
 0x223   :  { %3650 = vmatprep.subr.bf16.mxu0 %v5200_v48 }
 0x226   :  { %3651 = vmatpush1.bf16.msra.mxu0 %v5198_v49 }
 0x227   :  { %3652 = vmatprep.subr.bf16.mxu0 %v5203_v51  ;;  %v5291_v51 = vld [vmem:[#allocation8 + $0x2d0] ss:$8 sps:$4 sm:$0xff]  }
 0x22a   :  { %3653 = vmatpush1.bf16.msra.mxu0 %v5201_v54 }
 0x22b   :  { %3654 = vmatprep.subr.bf16.mxu0 %v5206_v23 }
 0x22e   :  { %3655 = vmatpush2.bf16.msra.mxu0 %v5204_v55  ;;  %v5299_v55 = vld [vmem:[#allocation8 + $0x2c4] ss:$8 sps:$4 sm:$0xff]  }
 0x22f   :  { %3656 = vmatprep.subr.bf16.mxu0 %v5209_v56 }
 0x231   :  { %v2244_v24 = vpop.f32.mrf.mxu0 }
 0x232   :  { %3657 = vmatpush2.bf16.msra.mxu0 %v5207_v4  ;;  %v2245_v46 = vadd.f32 %v2244_v24, %v471_v37  ;;  %v5327_v24 = vld [vmem:[#allocation8 + $0x160] ss:$8 sps:$4 sm:$0xff]  }
 0x233   :  { %3658 = vmatprep.subr.bf16.mxu0 %v5212_v59  ;;  %v2246_v27 = vpop.f32.mrf.mxu0  ;;  %v2287_v28 = vpop.f32.mrf.mxu1 }
 0x234   :  { %v2247_v38 = vadd.f32 %v2246_v27, %v475_v31  ;;  %v2288_v59 = vadd.f32 %v2287_v28, %v2245_v46  ;;  %v5330_v27 = vld [vmem:[#allocation8 + $0x150] ss:$8 sps:$4 sm:$0xff]  }
 0x235   :  { %v2248_v33 = vpop.f32.mrf.mxu0  ;;  %v2289_v34 = vpop.f32.mrf.mxu1  ;;  %v5354_v46 = vld [vmem:[#allocation8 + $0x1d0] ss:$8 sps:$4 sm:$0xff]  }
 0x236   :  { %3659 = vmatpush2.bf16.msra.mxu0 %v5210_v35  ;;  %v2249_v44 = vadd.f32 %v2248_v33, %v471_v37  ;;  %v2290_v48 = vadd.f32 %v2289_v34, %v2247_v38  ;;  %v5339_v33 = vld [vmem:[#allocation8 + $0x120] ss:$8 sps:$4 sm:$0xff]   ;;  %v5344_v34 = vld [vmem:[#allocation8 + $0x114] ss:$8 sps:$4 sm:$0xff]   ;;  %v5347_v37 = vld [vmem:[#allocation8 + $0x104] ss:$8 sps:$4 sm:$0xff]  }
 0x237   :  { %3660 = vmatprep.subr.bf16.mxu0 %v5215_v60  ;;  %v2250_v41 = vpop.f32.mrf.mxu0  ;;  %v2291_v42 = vpop.f32.mrf.mxu1  ;;  %v5345_v38 = vld [vmem:[#allocation8 + $0x100] ss:$8 sps:$4 sm:$0xff]  }
 0x238   :  { %v2251_v49 = vadd.f32 %v2250_v41, %v475_v31  ;;  %v2292_v56 = vadd.f32 %v2291_v42, %v2249_v44  ;;  %v5336_v31 = vld [vmem:[#allocation8 + $0x130] ss:$8 sps:$4 sm:$0xff]   ;;  %v5353_v42 = vld [vmem:[#allocation8 + $0x1e4] ss:$8 sps:$4 sm:$0xff]   ;;  %v5356_v44 = vld [vmem:[#allocation8 + $0x1d4] ss:$8 sps:$4 sm:$0xff]  }
 0x239   :  { %v2293_v54 = vpop.f32.mrf.mxu1  ;;  %v5348_v41 = vld [vmem:[#allocation8 + $0x1f0] ss:$8 sps:$4 sm:$0xff]  }
 0x23a   :  { %3661 = vmatpush2.bf16.msra.mxu0 %v5213_v61  ;;  %v2294_v60 = vadd.f32 %v2293_v54, %v2251_v49  ;;  %v5362_v49 = vld [vmem:[#allocation8 + $0x1b4] ss:$8 sps:$4 sm:$0xff]   ;;  %v5365_v54 = vld [vmem:[#allocation8 + $0x1a4] ss:$8 sps:$4 sm:$0xff]  }
 0x23b   :  { %3662 = vmatprep.subr.bf16.mxu0 %v5218_v62  ;;  %v5297_v62 = vld [vmem:[#allocation8 + $0x2c0] ss:$8 sps:$4 sm:$0xff]  }
 0x23e   :  { %3663 = vmatpush2.bf16.msra.mxu0 %v5216_v63 }
 0x23f   :  { %3664 = vmatprep.subr.bf16.mxu0 %v5221_v0 }
 0x242   :  { %3665 = vmatpush2.bf16.msra.mxu0 %v5219_v39  ;;  %v5305_v39 = vld [vmem:[#allocation8 + $0x2b4] ss:$8 sps:$4 sm:$0xff]  }
 0x243   :  { %3666 = vmatprep.subr.bf16.mxu0 %v5224_v1 }
 0x246   :  { %3667 = vmatpush2.bf16.msra.mxu0 %v5222_v2  ;;  %v5303_v2 = vld [vmem:[#allocation8 + $0x2b0] ss:$8 sps:$4 sm:$0xff]  }
 0x247   :  { %3668 = vmatprep.subr.bf16.mxu0 %v5227_v3  ;;  %v5311_v3 = vld [vmem:[#allocation8 + $0x2a4] ss:$8 sps:$4 sm:$0xff]  }
 0x24a   :  { %3669 = vmatpush2.bf16.msra.mxu0 %v5225_v5  ;;  %v5309_v5 = vld [vmem:[#allocation8 + $0x2a0] ss:$8 sps:$4 sm:$0xff]  }
 0x24b   :  { %3720 = vmatprep.subr.bf16.mxu0 %v5233_v8  ;;  %v5317_v8 = vld [vmem:[#allocation8 + $0x294] ss:$8 sps:$4 sm:$0xff]  }
 0x24d   :  { %3671 = vmatmul.mubr.bf16.vlgmr.msra.gmra.mxu0 %v2351_v13  ;;  %v5323_v13 = vld [vmem:[#allocation8 + $0x284] ss:$8 sps:$4 sm:$0xff]  }
 0x24e   :  { %3721 = vmatpush1.bf16.msra.mxu0 %v5231_v11 }
 0x24f   :  { %3722 = vmatprep.subr.bf16.mxu0 %v5239_v50 }
 0x252   :  { %3723 = vmatpush1.bf16.msra.mxu0 %v5237_v14 }
 0x253   :  { %3724 = vmatprep.subr.bf16.mxu0 %v5245_v58  ;;  %v5321_v58 = vld [vmem:[#allocation8 + $0x280] ss:$8 sps:$4 sm:$0xff]  }
 0x256   :  { %3725 = vmatpush1.bf16.msra.mxu0 %v5243_v17 }
 0x257   :  { %3726 = vmatprep.subr.bf16.mxu0 %v5251_v19 }
 0x25a   :  { %3727 = vmatpush1.bf16.msra.mxu0 %v5249_v20 }
 0x25b   :  { %3728 = vmatprep.subr.bf16.mxu0 %v5257_v22  ;;  %v5324_v22 = vld [vmem:[#allocation8 + $0x170] ss:$8 sps:$4 sm:$0xff]  }
 0x25e   :  { %3729 = vmatpush1.bf16.msra.mxu0 %v5255_v45 }
 0x25f   :  { %3730 = vmatprep.subr.bf16.mxu0 %v5263_v15  ;;  %v5329_v15 = vld [vmem:[#allocation8 + $0x164] ss:$8 sps:$4 sm:$0xff]  }
 0x262   :  { %3731 = vmatpush1.bf16.msra.mxu0 %v5261_v52 }
 0x263   :  { %3732 = vmatprep.subr.bf16.mxu0 %v5269_v7 }
 0x266   :  { %3733 = vmatpush1.bf16.msra.mxu0 %v5267_v53 }
 0x267   :  { %3734 = vmatprep.subr.bf16.mxu0 %v5275_v25 }
 0x26a   :  { %3735 = vmatpush1.bf16.msra.mxu0 %v5273_v26 }
 0x26b   :  { %3736 = vmatprep.subr.bf16.mxu0 %v5281_v29  ;;  %v5335_v29 = vld [vmem:[#allocation8 + $0x144] ss:$8 sps:$4 sm:$0xff]  }
 0x26e   :  { %3737 = vmatpush2.bf16.msra.mxu0 %v5279_v32  ;;  %v5341_v32 = vld [vmem:[#allocation8 + $0x124] ss:$8 sps:$4 sm:$0xff]  }
 0x26f   :  { %3738 = vmatprep.subr.bf16.mxu0 %v5287_v36  ;;  %v5342_v36 = vld [vmem:[#allocation8 + $0x110] ss:$8 sps:$4 sm:$0xff]  }
 0x271   :  { %v2330_v47 = vpop.f32.mrf.mxu0 }
 0x272   :  { %3739 = vmatpush2.bf16.msra.mxu0 %v5285_v40  ;;  %v2331_v63 = vadd.f32 %v2330_v47, %v2288_v59  ;;  %v5350_v40 = vld [vmem:[#allocation8 + $0x1f4] ss:$8 sps:$4 sm:$0xff]   ;;  %v5359_v47 = vld [vmem:[#allocation8 + $0x1c4] ss:$8 sps:$4 sm:$0xff]   ;;  %v5369_v59 = vld [vmem:[#allocation8 + $0x180] ss:$8 sps:$4 sm:$0xff]  }
 0x273   :  { %v2332_v23 = vpop.f32.mrf.mxu0  ;;  %3740 = vmatprep.subr.bf16.mxu0 %v5293_v43  ;;  %v5351_v43 = vld [vmem:[#allocation8 + $0x1e0] ss:$8 sps:$4 sm:$0xff]  }
 0x274   :  { %v2333_v4 = vadd.f32 %v2332_v23, %v2290_v48  ;;  %v5357_v48 = vld [vmem:[#allocation8 + $0x1c0] ss:$8 sps:$4 sm:$0xff]  }
 0x275   :  { %v2334_v35 = vpop.f32.mrf.mxu0  ;;  %v5363_v23 = vld [vmem:[#allocation8 + $0x1a0] ss:$8 sps:$4 sm:$0xff]  }
 0x276   :  { %5404 = vtanh.f32 %v2333_v4  ;;  %v2335_v61 = vadd.f32 %v2334_v35, %v2292_v56  ;;  %3741 = vmatpush2.bf16.msra.mxu0 %v5291_v51  ;;  %v5360_v51 = vld [vmem:[#allocation8 + $0x1b0] ss:$8 sps:$4 sm:$0xff]   ;;  %v5371_v4 = vld [vmem:[#allocation8 + $0x184] ss:$8 sps:$4 sm:$0xff]  }
 0x277   :  { %v2336_v0 = vpop.f32.mrf.mxu0  ;;  %3742 = vmatprep.subr.bf16.mxu0 %v5299_v55  ;;  %5406 = vtanh.f32 %v5809_v16  ;;  %v5368_v55 = vld [vmem:[#allocation8 + $0x194] ss:$8 sps:$4 sm:$0xff]   ;;  %v5366_v56 = vld [vmem:[#allocation8 + $0x190] ss:$8 sps:$4 sm:$0xff]  }
 0x278   :  { %v2337_v1 = vadd.f32 %v2336_v0, %v2294_v60  ;;  %5408 = vtanh.f32 %v2335_v61  ;;  %v5372_v0 = vld [vmem:[%s5896_s6 + $0x78] sm:$0xff]  }
 0x27a   :  { %5410 = vtanh.f32 %v2337_v1  ;;  %3743 = vmatpush2.bf16.msra.mxu0 %v5297_v62  ;;  %v5374_v1 = vld [vmem:[%s5896_s6 + $0x70] sm:$0xff]  }
 0x27b   :  { %5412 = vtanh.f32 %v2331_v63  ;;  %3744 = vmatprep.subr.bf16.mxu0 %v5305_v39  ;;  %v5373_v39 = vld [vmem:[%s5896_s6 + $0x38] sm:$0xff]  }
 0x27c   :  { %5414 = vtanh.f32 %v5806_v6 }
 0x27e   :  { %3745 = vmatpush2.bf16.msra.mxu0 %v5303_v2  ;;  %v5375_v2 = vld [vmem:[%s5896_s6 + $0x30] sm:$0xff]  }
 0x27f   :  { %3746 = vmatprep.subr.bf16.mxu0 %v5311_v3  ;;  %v5376_v3 = vld [vmem:[%s5896_s6 + $0x68] sm:$0xff]  }
 0x282   :  { %3747 = vmatpush2.bf16.msra.mxu0 %v5309_v5  ;;  %v5377_v5 = vld [vmem:[%s5896_s6 + $0x28] sm:$0xff]  }
 0x283   :  { %v5405_v11 = vpop.eup %5404  ;;  %3748 = vmatprep.subr.bf16.mxu0 %v5317_v8  ;;  %v5378_v8 = vld [vmem:[%s5896_s6 + $0x60] sm:$0xff]  }
 0x284   :  { %v2356_v50 = vpack.c.bf16 %v5405_v11, %v5405_v11  ;;  %v5407_v14 = vpop.eup %5406  ;;  %v5380_v11 = vld [vmem:[%s5896_s6 + $0x58] sm:$0xff]  }
 0x285   :  { %v5409_v16 = vpop.eup %5408  ;;  %v2354_v52 = vpack.c.bf16 %v5407_v14, %v5407_v14  ;;  %v5383_v14 = vld [vmem:[%s5896_s6 + $0x10] sm:$0xff]  }
 0x286   :  { %3749 = vmatpush2.bf16.msra.mxu0 %v5315_v9  ;;  %3752 = vmatprep.mubr.bf16.mxu0 %v2356_v50  ;;  %v2361_v45 = vpack.c.bf16 %v5409_v16, %v5409_v16  ;;  %v5379_v9 = vld [vmem:[%s5896_s6 + $0x20] sm:$0xff]   ;;  %v5382_v50 = vld [vmem:[%s5896_s6 + $0x50] sm:$0xff]  }
 0x287   :  { %v5411_v17 = vpop.eup %5410  ;;  %3750 = vmatprep.subr.bf16.mxu0 %v5323_v13  ;;  %v5381_v13 = vld [vmem:[%s5896_s6 + $0x18] sm:$0xff]  }
 0x288   :  { %v5413_v19 = vpop.eup %5412  ;;  %v2362_v20 = vpack.c.bf16 %v5411_v17, %v5411_v17  ;;  %v5384_v17 = vld [vmem:[%s5896_s6 + $0x48] sm:$0xff]  }
 0x289   :  { %v2355_v7 = vpack.c.bf16 %v5413_v19, %v5413_v19  ;;  %v5415_v35 = vpop.eup %5414  ;;  %v5385_v19 = vld [vmem:[%s5896_s6 + $0x8] sm:$0xff]  }
 0x28a   :  { %3751 = vmatpush2.bf16.msra.mxu0 %v5321_v58  ;;  %3149 = vmatprep.mubr.bf16.mxu1 %v2362_v20  ;;  %v2353_v60 = vpack.c.bf16 %v5415_v35, %v5415_v35 }
 0x28b   :  { %v5816_v53 = vpop.f32.mrf.mxu1  ;;  %3150 = vmatmul.mubr.bf16.vlgmr.msra.gmra.mxu1 %v2361_v45  ;;  %v5386_v45 = vld [vmem:[%s5896_s6 + $0x40] sm:$0xff]  }
 0x28c   :  { %3680 = vmatpush1.bf16.msra.mxu1 %v5324_v22  ;;  %3711 = vmatprep.mubr.bf16.mxu1 %v2354_v52  ;;  %v5630_v52 = vmov 0.0  }
 0x28d   :  { %3753 = vmatmul.mubr.bf16.vlgmr.msra.gmra.mxu0 %v2355_v7  ;;  %v5818_v25 = vpop.f32.mrf.mxu1  ;;  %3681 = vmatprep.subr.bf16.mxu1 %v5329_v15  ;;  %v5387_v15 = vld [vmem:[%s5896_s6] sm:$0xff]  }
 0x28f   :  { %v3073_v26 = vpop.f32.mrf.mxu1 }
 0x290   :  { %3682 = vmatpush1.bf16.msra.mxu1 %v5327_v24 }
 0x291   :  { %v3074_v28 = vpop.f32.mrf.mxu1  ;;  %3683 = vmatprep.subr.bf16.mxu1 %v5332_v10 }
 0x294   :  { %3684 = vmatpush1.bf16.msra.mxu1 %v5330_v27 }
 0x295   :  { %3685 = vmatprep.subr.bf16.mxu1 %v5335_v29 }
 0x298   :  { %3686 = vmatpush1.bf16.msra.mxu1 %v5333_v57 }
 0x299   :  { %3687 = vmatprep.subr.bf16.mxu1 %v5338_v30 }
 0x29c   :  { %3688 = vmatpush1.bf16.msra.mxu1 %v5336_v31 }
 0x29d   :  { %3689 = vmatprep.subr.bf16.mxu1 %v5341_v32 }
 0x2a0   :  { %3690 = vmatpush1.bf16.msra.mxu1 %v5339_v33 }
 0x2a1   :  { %3691 = vmatprep.subr.bf16.mxu1 %v5344_v34 }
 0x2a4   :  { %3692 = vmatpush1.bf16.msra.mxu1 %v5342_v36 }
 0x2a5   :  { %3693 = vmatprep.subr.bf16.mxu1 %v5347_v37  ;;  %v3761_v37 = vld [vmem:[#allocation11] sm:$0x3] }
 0x2a8   :  { %3694 = vmatpush1.bf16.msra.mxu1 %v5345_v38 }
 0x2a9   :  { %3695 = vmatprep.subr.bf16.mxu1 %v5350_v40 }
 0x2ac   :  { %3696 = vmatpush2.bf16.msra.mxu1 %v5348_v41 }
 0x2ad   :  { %3697 = vmatprep.subr.bf16.mxu1 %v5353_v42 }
 0x2b0   :  { %3698 = vmatpush2.bf16.msra.mxu1 %v5351_v43  ;;  %v3770_v43 = vrot.slane %v3761_v37, %v458_v21  ;;  %v5391_v21 = vld [vmem:[%s5898_s8] sm:$0xff]  }
 0x2b1   :  { %3699 = vmatprep.subr.bf16.mxu1 %v5356_v44 }
 0x2b4   :  { %3700 = vmatpush2.bf16.msra.mxu1 %v5354_v46 }
 0x2b5   :  { %3701 = vmatprep.subr.bf16.mxu1 %v5359_v47 }
 0x2b8   :  { %3702 = vmatpush2.bf16.msra.mxu1 %v5357_v48 }
 0x2b9   :  { %3703 = vmatprep.subr.bf16.mxu1 %v5362_v49 }
 0x2bc   :  { %3704 = vmatpush2.bf16.msra.mxu1 %v5360_v51 }
 0x2bd   :  { %3705 = vmatprep.subr.bf16.mxu1 %v5365_v54 }
 0x2c0   :  { %3706 = vmatpush2.bf16.msra.mxu1 %v5363_v23 }
 0x2c1   :  { %3707 = vmatprep.subr.bf16.mxu1 %v5368_v55  ;;  %v5388_v55 = vld [vmem:[%s5898_s8 + $0x18] sm:$0xff]  }
 0x2c4   :  { %3708 = vmatpush2.bf16.msra.mxu1 %v5366_v56 }
 0x2c5   :  { %3709 = vmatprep.subr.bf16.mxu1 %v5371_v4 }
 0x2c8   :  { %3710 = vmatpush2.bf16.msra.mxu1 %v5369_v59  ;;  %v4563_v59 = vld [vmem:[#allocation13] ss:$0 sm:$0xff] }
 0x2c9   :  { %4589 = vmatprep.subr.bf16.mxu1 %v5372_v0 }
 0x2cb   :  { %3712 = vmatmul.mubr.bf16.vlgmr.msra.gmra.mxu1 %v2353_v60 }
 0x2cc   :  { %4590 = vmatpush3.bf16.msra.mxu1 %v5373_v39  ;;  %v4580_v39 = vld [vmem:[#allocation14] ss:$0 sm:$0xff] }
 0x2cd   :  { %v3110_v61 = vpop.f32.mrf.mxu0  ;;  %4591 = vmatprep.subr.bf16.mxu1 %v5374_v1 }
 0x2ce   :  { %v3111_v7 = vadd.f32 %v3110_v61, %v5816_v53  ;;  %v3766_v53 = vrot.slane %v3761_v37, %v454_v18  ;;  %v5390_v18 = vld [vmem:[%s5898_s8 + $0x8] sm:$0xff]  }
 0x2cf   :  { %v3112_v62 = vpop.f32.mrf.mxu0 }
 0x2d0   :  { %4592 = vmatpush3.bf16.msra.mxu1 %v5375_v2  ;;  %v3113_v10 = vadd.f32 %v3112_v62, %v5818_v25 }
 0x2d1   :  { %v3114_v6 = vpop.f32.mrf.mxu0  ;;  %4593 = vmatprep.subr.bf16.mxu1 %v5376_v3 }
 0x2d3   :  { %v3115_v63 = vpop.f32.mrf.mxu0 }
 0x2d4   :  { %4594 = vmatpush3.bf16.msra.mxu1 %v5377_v5  ;;  %v4586_v5 = vld [vmem:[#allocation16] ss:$0 sm:$0xff] }
 0x2d5   :  { %4595 = vmatprep.subr.bf16.mxu1 %v5378_v8 }
 0x2d8   :  { %4596 = vmatpush3.bf16.msra.mxu1 %v5379_v9 }
 0x2d9   :  { %4597 = vmatprep.subr.bf16.mxu1 %v5380_v11 }
 0x2dc   :  { %4598 = vmatpush3.bf16.msra.mxu1 %v5381_v13 }
 0x2dd   :  { %4599 = vmatprep.subr.bf16.mxu1 %v5382_v50 }
 0x2e0   :  { %4600 = vmatpush3.bf16.msra.mxu1 %v5383_v14  ;;  %v4587_v14 = vld [vmem:[#allocation2] ss:$0 sm:$0xff] }
 0x2e1   :  { %4601 = vmatprep.subr.bf16.mxu1 %v5384_v17 }
 0x2e4   :  { %4602 = vmatpush3.bf16.msra.mxu1 %v5385_v19 }
 0x2e5   :  { %4603 = vmatprep.subr.bf16.mxu1 %v5386_v45 }
 0x2e8   :  { %4604 = vmatpush3.bf16.msra.mxu1 %v5387_v15 }
 0x2e9   :  { %4616 = vmatprep.subr.bf16.mxu1 %v5630_v52 }
 0x30d   :  { %v3672_v16 = vpop.f32.mrf.mxu0 }
 0x30f   :  { %v3674_v58 = vpop.f32.mrf.mxu0 }
 0x311   :  { %v3676_v20 = vpop.f32.mrf.mxu0 }
 0x313   :  { %v3677_v22 = vpop.f32.mrf.mxu0 }
 0x34b   :  { %v3151_v24 = vpop.f32.mrf.mxu1 }
 0x34c   :  { %v3152_v26 = vadd.f32 %v3151_v24, %v3111_v7 }
 0x34d   :  { %v3754_v27 = vpop.f32.mrf.mxu0  ;;  %v3153_v28 = vpop.f32.mrf.mxu1 }
 0x34e   :  { %v3154_v29 = vadd.f32 %v3153_v28, %v3113_v10  ;;  %v3673_v57 = vadd.f32 %v3672_v16, %v3152_v26 }
 0x34f   :  { %v3756_v30 = vpop.f32.mrf.mxu0  ;;  %v3155_v31 = vpop.f32.mrf.mxu1 }
 0x350   :  { %v3675_v32 = vadd.f32 %v3674_v58, %v3154_v29 }
 0x351   :  { %v3758_v33 = vpop.f32.mrf.mxu0  ;;  %v3156_v34 = vpop.f32.mrf.mxu1 }
 0x353   :  { %v3759_v36 = vpop.f32.mrf.mxu0 }
 0x38b   :  { %v3713_v38 = vpop.f32.mrf.mxu1 }
 0x38c   :  { %v3714_v40 = vadd.f32 %v3713_v38, %v3673_v57 }
 0x38d   :  { %v3715_v41 = vpop.f32.mrf.mxu1 }
 0x38e   :  { %v3755_v42 = vadd.f32 %v3754_v27, %v3714_v40  ;;  %v3716_v25 = vadd.f32 %v3715_v41, %v3675_v32 }
 0x38f   :  { %v3717_v44 = vpop.f32.mrf.mxu1 }
 0x390   :  { %v3773_v46 = vadd.f32 %v3766_v53, %v3755_v42  ;;  %v3757_v47 = vadd.f32 %v3756_v30, %v3716_v25 }
 0x391   :  { %v3718_v48 = vpop.f32.mrf.mxu1 }
 0x392   :  { %v3774_v49 = vadd.f32 %v3770_v43, %v3757_v47  ;;  %v3775_v51 = vmax.f32 %v3773_v46, 0.0 }
 0x394   :  { %v3776_v54 = vmax.f32 %v3774_v49, 0.0  ;;  %v3777_v56 = vpack.c.bf16 %v3775_v51, %v3775_v51 }
 0x396   :  { %v3778_v23 = vpack.c.bf16 %v3776_v54, %v3776_v54 }
 0x398   :  { %3946 = vmatprep.mubr.bf16.mxu1 %v3778_v23 }
 0x399   :  { %3947 = vmatmul.mubr.bf16.vlgmr.msra.gmra.mxu1 %v3777_v56 }
 0x39a   :  { %4617 = vmatpush3.bf16.msra.mxu1 %v5388_v55  ;;  %4624 = vmatprep.mubr.msk.bf16.mxu1 %vm5631_vm0, %v5630_v52 }
 0x39b   :  { %4618 = vmatprep.subr.bf16.mxu1 %v5630_v52 }
 0x39e   :  { %4619 = vmatpush3.bf16.msra.mxu1 %v5389_v12 }
 0x39f   :  { %4620 = vmatprep.subr.bf16.mxu1 %v5630_v52 }
 0x3a2   :  { %4621 = vmatpush3.bf16.msra.mxu1 %v5390_v18 }
 0x3a3   :  { %4622 = vmatprep.subr.bf16.mxu1 %v5630_v52 }
 0x3a6   :  { %4623 = vmatpush3.bf16.msra.mxu1 %v5391_v21 }
 0x459   :  { %v4605_v4 = vpop.f32.mrf.mxu1 }
 0x45b   :  { %v4606_v35 = vpop.f32.mrf.mxu1 }
 0x45c   :  { %v4607_v60 = vadd.f32 %v4606_v35, %v4605_v4 }
 0x45d   :  { %v4608_v61 = vpop.f32.mrf.mxu1 }
 0x45e   :  { %v3949_v62 = vadd.f32 %v4607_v60, %v4563_v59 }
 0x45f   :  { %v4609_v6 = vpop.f32.mrf.mxu1 }
 0x460   :  { %v3954_v63 = vmax.f32 %v3949_v62, 0.0 }
 0x462   :  { %v3955_v0 = vpack.c.bf16 %v3954_v63, %v3954_v63 }
 0x464   :  { %4625 = vmatmul.mubr.msk.bf16.vlgmr.msra.gmra.mxu1 %vm3995_vm1, %v3955_v0 }
 0x524   :  { %v4033_v1 = vpop.f32.mrf.mxu1 }
 0x525   :  { %v4034_v2 = vadd.f32 %v4580_v39, %v4033_v1 }
 0x526   :  { %v4626_v3 = vpop.f32.mrf.mxu1 }
 0x527   :  { %v4039_v8 = vmax.f32 %v4034_v2, 0.0 }
 0x528   :  { %v4036_v9 = vpop.f32.mrf.mxu1 }
 0x529   :  { %v4047_v11 = vmul.f32 %v4586_v5, %v4039_v8 }
 0x52a   :  { %v4627_v13 = vpop.f32.mrf.mxu1 }
 0x52b   :  { %v4049_v50 = vsel %vm4048_vm2, %v4047_v11, 0.0 }
 0x52c   :  { %4050 = vadd.xlane.f32.xlu0 %v4049_v50 }
 0x5b5   :  { %v4051_v16 = vpop.xlane.xlu0 %4050 }
 0x5b6   :  { %v4059_v58 = vadd.f32 %v4587_v14, %v4051_v16 }
 0x5b8   :  { %v4588_v17 = vmul.f32 -1.442695, %v4059_v58 }
 0x5ba   :  { %5416 = vpow2.f32 %v4588_v17 }
 0x5c7   :  { %v5417_v19 = vpop.eup %5416 }
 0x5c8   :  { %v4063_v20 = vadd.f32 1.0, %v5417_v19 }
 0x5ca   :  { %5418 = vrcp.f32 %v4063_v20 }
 0x5d7   :  { %v5419_v22 = vpop.eup %5418 }
 0x5d8   :  { %4067 = vst.msk [vmem:[%s5902_s12] sm:$0xff] %vm4066_vm3, %v5419_v22 }
 0x5d9   :  { %4072 = vsyncpa [#allocation4], 1 }
 0x5da   :  { %4073 = vsyncpa [#allocation6], 1 }
 0x5db   :  { %4074 = vsyncpa [#allocation9], 1 }
 0x5dc   :  { %4075 = vsyncpa [#allocation12], 1 }
 0x5dd   :  { %4076 = vsyncpa [#allocation15], 1 }

</bundles_post_ra>
